<compile_context>
chip_gen: v7x
topology: tpu7x:2x2x1
jax: 0.10.0
libtpu: 0.0.40
codegen_flags: <defaults>
</compile_context>

<pallas_src>
import math

import jax
import jax.numpy as jnp
from jax import lax
from jax.experimental import pallas as pl
from jax.experimental.pallas import tpu as pltpu


# ----------------------------- Fused Pallas kernel ------------------------------ #

def _make_fused_lstm_kernel(num_layers, T, H):
    """Builds the fused kernel for a fixed layer count / sequence length / hidden size.

    Ref layout (all VMEM, whole-array):
      x_ref                     : (T, Bp, D)      time-major, batch padded to Bp
      per layer l               : w_ih (D_in,4H), w_hh (H,4H), b (1,4H)   [b = b_ih+b_hh]
      fc_w_ref                  : (1, H)
      fc_b_ref                  : (1, 1)
      out_ref                   : (Bp, 1)
      scratch: seq_sc (T,Bp,H)  inter-layer hidden sequence
               pre_sc (T,Bp,4H) hoisted pre-gates
               h_sc, c_sc (Bp,H) recurrent state
    Gate order matches PyTorch: [i, f, g, o] along the 4H axis.
    """

    def kernel(*refs):
        x_ref = refs[0]
        per_layer = refs[1:1 + 3 * num_layers]
        fc_w_ref = refs[1 + 3 * num_layers]
        fc_b_ref = refs[2 + 3 * num_layers]
        out_ref = refs[3 + 3 * num_layers]
        seq_sc, pre_sc, h_sc, c_sc = refs[4 + 3 * num_layers:]

        Bp = h_sc.shape[0]

        for layer in range(num_layers):            # static Python loop over layers
            w_ih = per_layer[3 * layer][...]       # (D_in, 4H)
            w_hh = per_layer[3 * layer + 1][...]   # (H, 4H)
            b = per_layer[3 * layer + 2][...]      # (1, 4H)
            is_last = layer == num_layers - 1

            # --- Hoisted input projection: one large MXU matmul per layer. ---
            xin = x_ref[...] if layer == 0 else seq_sc[...]     # (T, Bp, D_in)
            d_in = xin.shape[-1]
            pre = jnp.dot(xin.reshape(T * Bp, d_in), w_ih,
                          preferred_element_type=jnp.float32) + b
            pre_sc[...] = pre.reshape(T, Bp, 4 * H)

            h_sc[...] = jnp.zeros_like(h_sc)
            c_sc[...] = jnp.zeros_like(c_sc)

            # --- Serial recurrence: only h @ W_hh + gate math per step. ---
            def step(t, carry, w_hh=w_hh, is_last=is_last):
                gates = pre_sc[t] + jnp.dot(h_sc[...], w_hh,
                                            preferred_element_type=jnp.float32)
                i_g = jax.nn.sigmoid(gates[:, 0 * H:1 * H])
                f_g = jax.nn.sigmoid(gates[:, 1 * H:2 * H])
                g_g = jnp.tanh(gates[:, 2 * H:3 * H])
                o_g = jax.nn.sigmoid(gates[:, 3 * H:4 * H])
                c_new = f_g * c_sc[...] + i_g * g_g
                h_new = o_g * jnp.tanh(c_new)
                c_sc[...] = c_new
                h_sc[...] = h_new
                if not is_last:
                    seq_sc[t] = h_new       # last layer: only final h is consumed
                return carry

            lax.fori_loop(0, T, step, 0, unroll=True)

        # --- FC head fused in: VPU multiply + lane reduce, single (Bp,1) store. ---
        out_ref[...] = (
            jnp.sum(h_sc[...] * fc_w_ref[...], axis=-1, keepdims=True)
            + fc_b_ref[...]
        ).astype(out_ref.dtype)

    return kernel


# ------------------------------ Wrapper ----------------------------------- #

def _vmem_spec():
    return pl.BlockSpec(memory_space=pltpu.MemorySpace.VMEM)


def prepare_params(lstm_params, fc_w, fc_b):
    """Pre-transpose weights once (outside the forward) to MXU-friendly layouts."""
    layers = [(w_ih.T, w_hh.T, (b_ih + b_hh).reshape(1, -1))
              for (w_ih, w_hh, b_ih, b_hh) in lstm_params]
    return layers, fc_w.reshape(1, -1), fc_b.reshape(1, 1)


def lstm_model_pallas(x, layers_t, fc_w_row, fc_b_11):
    """Equivalent of LSTMModel.forward. x: (B, T, input_size) -> (B, 1)."""
    B, T, _ = x.shape
    H = layers_t[0][1].shape[0]
    num_layers = len(layers_t)
    Bp = max(8, ((B + 7) // 8) * 8)          # sublane-dense batch

    x_tbd = jnp.transpose(x, (1, 0, 2)).astype(jnp.float32)   # (T, B, D)
    if Bp != B:
        x_tbd = jnp.pad(x_tbd, ((0, 0), (0, Bp - B), (0, 0)))

    args = [x_tbd]
    for (w_ih_t, w_hh_t, b) in layers_t:
        args += [w_ih_t, w_hh_t, b]
    args += [fc_w_row, fc_b_11]

    scratch_shapes = [
        pltpu.VMEM((T, Bp, H), jnp.float32),       # inter-layer hidden sequence
        pltpu.VMEM((T, Bp, 4 * H), jnp.float32),   # hoisted pre-gates
        pltpu.VMEM((Bp, H), jnp.float32),          # h state
        pltpu.VMEM((Bp, H), jnp.float32),          # c state
    ]

    # Explicit VMEM budget sized to the resident buffers (with headroom), not the
    # scoped default.
    def _nbytes(a):
        return int(math.prod(a.shape)) * a.dtype.itemsize
    resident = sum(_nbytes(a) for a in args) + Bp * 1 * 4
    resident += (T * Bp * H + T * Bp * 4 * H + 2 * Bp * H) * 4
    vmem_limit = int(min(max(4 * resident, 8 * 1024 * 1024), 64 * 1024 * 1024))

    out = pl.pallas_call(
        _make_fused_lstm_kernel(num_layers, T, H),
        out_shape=jax.ShapeDtypeStruct((Bp, 1), jnp.float32),
        in_specs=[_vmem_spec()] * len(args),
        out_specs=_vmem_spec(),
        scratch_shapes=scratch_shapes,
        compiler_params=pltpu.CompilerParams(vmem_limit_bytes=vmem_limit),
    )(*args)
    return out[:B]


# --------------------------- Pure-JAX reference ----------------------------- #

def lstm_model_ref(x, lstm_params, fc_w, fc_b):
    h_seq = jnp.transpose(x, (1, 0, 2)).astype(jnp.float32)   # (T, B, D)
    for (w_ih, w_hh, b_ih, b_hh) in lstm_params:
        H = w_hh.shape[1]
        B = h_seq.shape[1]

        def step(carry, x_t):
            h, c = carry
            gates = x_t @ w_ih.T + h @ w_hh.T + b_ih + b_hh
            i = jax.nn.sigmoid(gates[:, :H])
            f = jax.nn.sigmoid(gates[:, H:2 * H])
            g = jnp.tanh(gates[:, 2 * H:3 * H])
            o = jax.nn.sigmoid(gates[:, 3 * H:])
            c = f * c + i * g
            h = o * jnp.tanh(c)
            return (h, c), h

        init = (jnp.zeros((B, H), jnp.float32), jnp.zeros((B, H), jnp.float32))
        _, h_seq = lax.scan(step, init, h_seq)
    return h_seq[-1] @ fc_w.T + fc_b


# --------------------------- Parameter init --------------------------------- #

def init_params(key, input_size, hidden_size, num_layers):
    """Deterministic init matching nn.LSTM / nn.Linear parameter shapes."""
    k = 1.0 / math.sqrt(hidden_size)
    params = []
    in_dim = input_size
    for _ in range(num_layers):
        key, k1, k2, k3, k4 = jax.random.split(key, 5)
        w_ih = jax.random.uniform(k1, (4 * hidden_size, in_dim), jnp.float32, -k, k)
        w_hh = jax.random.uniform(k2, (4 * hidden_size, hidden_size), jnp.float32, -k, k)
        b_ih = jax.random.uniform(k3, (4 * hidden_size,), jnp.float32, -k, k)
        b_hh = jax.random.uniform(k4, (4 * hidden_size,), jnp.float32, -k, k)
        params.append((w_ih, w_hh, b_ih, b_hh))
        in_dim = hidden_size
    key, k1, k2 = jax.random.split(key, 3)
    fc_w = jax.random.uniform(k1, (1, hidden_size), jnp.float32, -k, k)
    fc_b = jax.random.uniform(k2, (1,), jnp.float32, -k, k)
    return params, fc_w, fc_b


# --------------------------------- Main ------------------------------------- #

if __name__ == "__main__":
    B, T, INPUT_SIZE, HIDDEN, LAYERS = 2, 8, 4, 32, 2

    key = jax.random.PRNGKey(0)
    key, xkey, pkey = jax.random.split(key, 3)
    x = jax.random.normal(xkey, (B, T, INPUT_SIZE), dtype=jnp.float32)
    lstm_params, fc_w, fc_b = init_params(pkey, INPUT_SIZE, HIDDEN, LAYERS)

    layers_t, fc_w_row, fc_b_11 = prepare_params(lstm_params, fc_w, fc_b)

    out = jax.block_until_ready(lstm_model_pallas(x, layers_t, fc_w_row, fc_b_11))
    ref = jax.block_until_ready(lstm_model_ref(x, lstm_params, fc_w, fc_b))

    assert out.shape == (B, 1), out.shape
    assert jnp.allclose(out, ref, atol=1e-4, rtol=1e-4), (out, ref)
    print("KERNEL_OK")
</pallas_src>

<mosaic_0001>
module attributes {stable_mosaic.version = 11 : i64} {
  func.func @kernel(%arg0: memref<8x8x4xf32, #tpu.memory_space<vmem>>, %arg1: memref<4x128xf32, #tpu.memory_space<vmem>>, %arg2: memref<32x128xf32, #tpu.memory_space<vmem>>, %arg3: memref<1x128xf32, #tpu.memory_space<vmem>>, %arg4: memref<32x128xf32, #tpu.memory_space<vmem>>, %arg5: memref<32x128xf32, #tpu.memory_space<vmem>>, %arg6: memref<1x128xf32, #tpu.memory_space<vmem>>, %arg7: memref<1x32xf32, #tpu.memory_space<vmem>>, %arg8: memref<1x1xf32, #tpu.memory_space<vmem>>, %arg9: memref<8x1xf32, #tpu.memory_space<vmem>>, %arg10: memref<8x8x32xf32, #tpu.memory_space<vmem>>, %arg11: memref<8x8x128xf32, #tpu.memory_space<vmem>>, %arg12: memref<8x32xf32, #tpu.memory_space<vmem>>, %arg13: memref<8x32xf32, #tpu.memory_space<vmem>>) attributes {dimension_semantics = [], scalar_prefetch = 0 : i64, scratch_operands = 4 : i64, tpu.core_type = #tpu.core_type<tc>} {
    %c0 = arith.constant 0 : index
    %c0_0 = arith.constant 0 : index
    %0 = vector.load %arg1[%c0, %c0_0] : memref<4x128xf32, #tpu.memory_space<vmem>>, vector<4x128xf32>
    %c0_1 = arith.constant 0 : index
    %c0_2 = arith.constant 0 : index
    %1 = vector.load %arg2[%c0_1, %c0_2] : memref<32x128xf32, #tpu.memory_space<vmem>>, vector<32x128xf32>
    %c0_3 = arith.constant 0 : index
    %c0_4 = arith.constant 0 : index
    %2 = vector.load %arg3[%c0_3, %c0_4] : memref<1x128xf32, #tpu.memory_space<vmem>>, vector<1x128xf32>
    %c0_5 = arith.constant 0 : index
    %c0_6 = arith.constant 0 : index
    %c0_7 = arith.constant 0 : index
    %3 = vector.load %arg0[%c0_5, %c0_6, %c0_7] : memref<8x8x4xf32, #tpu.memory_space<vmem>>, vector<8x8x4xf32>
    %4 = vector.shape_cast %3 : vector<8x8x4xf32> to vector<64x4xf32>
    %cst = arith.constant dense<0.000000e+00> : vector<64x128xf32>
    %5 = tpu.matmul %4, %0, %cst {dimension_numbers = #tpu.dot_dimension_numbers<[1], [0], [0], [1], [0, 0, 1, 1], [], []>} : vector<64x4xf32>, vector<4x128xf32>, vector<64x128xf32> -> vector<64x128xf32>
    %6 = vector.broadcast %2 : vector<1x128xf32> to vector<64x128xf32>
    %7 = arith.addf %5, %6 : vector<64x128xf32>
    %8 = vector.shape_cast %7 : vector<64x128xf32> to vector<8x8x128xf32>
    %c0_8 = arith.constant 0 : index
    %c0_9 = arith.constant 0 : index
    %c0_10 = arith.constant 0 : index
    %9 = vector.load %arg11[%c0_8, %c0_9, %c0_10] : memref<8x8x128xf32, #tpu.memory_space<vmem>>, vector<8x8x128xf32>
    tpu.vector_store %arg11[%c0_8, %c0_9, %c0_10], %8 {strides = array<i32>} : memref<8x8x128xf32, #tpu.memory_space<vmem>>, vector<8x8x128xf32>,
    %cst_11 = arith.constant 0.000000e+00 : f32
    %10 = vector.broadcast %cst_11 : f32 to vector<8x32xf32>
    %c0_12 = arith.constant 0 : index
    %c0_13 = arith.constant 0 : index
    %11 = vector.load %arg12[%c0_12, %c0_13] : memref<8x32xf32, #tpu.memory_space<vmem>>, vector<8x32xf32>
    tpu.vector_store %arg12[%c0_12, %c0_13], %10 {strides = array<i32>} : memref<8x32xf32, #tpu.memory_space<vmem>>, vector<8x32xf32>,
    %cst_14 = arith.constant 0.000000e+00 : f32
    %12 = vector.broadcast %cst_14 : f32 to vector<8x32xf32>
    %c0_15 = arith.constant 0 : index
    %c0_16 = arith.constant 0 : index
    %13 = vector.load %arg13[%c0_15, %c0_16] : memref<8x32xf32, #tpu.memory_space<vmem>>, vector<8x32xf32>
    tpu.vector_store %arg13[%c0_15, %c0_16], %12 {strides = array<i32>} : memref<8x32xf32, #tpu.memory_space<vmem>>, vector<8x32xf32>,
    %c0_i32 = arith.constant 0 : i32
    %14 = arith.index_cast %c0_i32 : i32 to index
    %c0_17 = arith.constant 0 : index
    %c0_18 = arith.constant 0 : index
    %15 = vector.load %arg11[%14, %c0_17, %c0_18] : memref<8x8x128xf32, #tpu.memory_space<vmem>>, vector<1x8x128xf32>
    %16 = vector.shape_cast %15 : vector<1x8x128xf32> to vector<8x128xf32>
    %c0_19 = arith.constant 0 : index
    %c0_20 = arith.constant 0 : index
    %17 = vector.load %arg12[%c0_19, %c0_20] : memref<8x32xf32, #tpu.memory_space<vmem>>, vector<8x32xf32>
    %cst_21 = arith.constant dense<0.000000e+00> : vector<8x128xf32>
    %18 = tpu.matmul %17, %1, %cst_21 {dimension_numbers = #tpu.dot_dimension_numbers<[1], [0], [0], [1], [0, 0, 1, 1], [], []>} : vector<8x32xf32>, vector<32x128xf32>, vector<8x128xf32> -> vector<8x128xf32>
    %19 = arith.addf %16, %18 : vector<8x128xf32>
    %20 = vector.extract_strided_slice %19 {offsets = [0, 0], sizes = [8, 32], strides = [1, 1]} : vector<8x128xf32> to vector<8x32xf32>
    %21 = arith.negf %20 : vector<8x32xf32>
    %22 = math.exp %21 : vector<8x32xf32>
    %cst_22 = arith.constant 1.000000e+00 : f32
    %23 = vector.broadcast %cst_22 : f32 to vector<8x32xf32>
    %24 = arith.addf %23, %22 : vector<8x32xf32>
    %25 = arith.divf %23, %24 : vector<8x32xf32>
    %26 = vector.extract_strided_slice %19 {offsets = [0, 32], sizes = [8, 32], strides = [1, 1]} : vector<8x128xf32> to vector<8x32xf32>
    %27 = arith.negf %26 : vector<8x32xf32>
    %28 = math.exp %27 : vector<8x32xf32>
    %cst_23 = arith.constant 1.000000e+00 : f32
    %29 = vector.broadcast %cst_23 : f32 to vector<8x32xf32>
    %30 = arith.addf %29, %28 : vector<8x32xf32>
    %31 = arith.divf %29, %30 : vector<8x32xf32>
    %32 = vector.extract_strided_slice %19 {offsets = [0, 64], sizes = [8, 32], strides = [1, 1]} : vector<8x128xf32> to vector<8x32xf32>
    %33 = math.tanh %32 : vector<8x32xf32>
    %34 = vector.extract_strided_slice %19 {offsets = [0, 96], sizes = [8, 32], strides = [1, 1]} : vector<8x128xf32> to vector<8x32xf32>
    %35 = arith.negf %34 : vector<8x32xf32>
    %36 = math.exp %35 : vector<8x32xf32>
    %cst_24 = arith.constant 1.000000e+00 : f32
    %37 = vector.broadcast %cst_24 : f32 to vector<8x32xf32>
    %38 = arith.addf %37, %36 : vector<8x32xf32>
    %39 = arith.divf %37, %38 : vector<8x32xf32>
    %c0_25 = arith.constant 0 : index
    %c0_26 = arith.constant 0 : index
    %40 = vector.load %arg13[%c0_25, %c0_26] : memref<8x32xf32, #tpu.memory_space<vmem>>, vector<8x32xf32>
    %41 = arith.mulf %31, %40 : vector<8x32xf32>
    %42 = arith.mulf %25, %33 : vector<8x32xf32>
    %43 = arith.addf %41, %42 : vector<8x32xf32>
    %44 = math.tanh %43 : vector<8x32xf32>
    %45 = arith.mulf %39, %44 : vector<8x32xf32>
    %c0_27 = arith.constant 0 : index
    %c0_28 = arith.constant 0 : index
    %46 = vector.load %arg13[%c0_27, %c0_28] : memref<8x32xf32, #tpu.memory_space<vmem>>, vector<8x32xf32>
    tpu.vector_store %arg13[%c0_27, %c0_28], %43 {strides = array<i32>} : memref<8x32xf32, #tpu.memory_space<vmem>>, vector<8x32xf32>,
    %c0_29 = arith.constant 0 : index
    %c0_30 = arith.constant 0 : index
    %47 = vector.load %arg12[%c0_29, %c0_30] : memref<8x32xf32, #tpu.memory_space<vmem>>, vector<8x32xf32>
    tpu.vector_store %arg12[%c0_29, %c0_30], %45 {strides = array<i32>} : memref<8x32xf32, #tpu.memory_space<vmem>>, vector<8x32xf32>,
    %48 = arith.index_cast %c0_i32 : i32 to index
    %c0_31 = arith.constant 0 : index
    %c0_32 = arith.constant 0 : index
    %49 = vector.load %arg10[%48, %c0_31, %c0_32] : memref<8x8x32xf32, #tpu.memory_space<vmem>>, vector<1x8x32xf32>
    %50 = vector.shape_cast %49 : vector<1x8x32xf32> to vector<8x32xf32>
    %51 = vector.shape_cast %45 : vector<8x32xf32> to vector<1x8x32xf32>
    tpu.vector_store %arg10[%48, %c0_31, %c0_32], %51 {strides = array<i32>} : memref<8x8x32xf32, #tpu.memory_space<vmem>>, vector<1x8x32xf32>,
    %c1_i32 = arith.constant 1 : i32
    %52 = arith.index_cast %c1_i32 : i32 to index
    %c0_33 = arith.constant 0 : index
    %c0_34 = arith.constant 0 : index
    %53 = vector.load %arg11[%52, %c0_33, %c0_34] : memref<8x8x128xf32, #tpu.memory_space<vmem>>, vector<1x8x128xf32>
    %54 = vector.shape_cast %53 : vector<1x8x128xf32> to vector<8x128xf32>
    %c0_35 = arith.constant 0 : index
    %c0_36 = arith.constant 0 : index
    %55 = vector.load %arg12[%c0_35, %c0_36] : memref<8x32xf32, #tpu.memory_space<vmem>>, vector<8x32xf32>
    %cst_37 = arith.constant dense<0.000000e+00> : vector<8x128xf32>
    %56 = tpu.matmul %55, %1, %cst_37 {dimension_numbers = #tpu.dot_dimension_numbers<[1], [0], [0], [1], [0, 0, 1, 1], [], []>} : vector<8x32xf32>, vector<32x128xf32>, vector<8x128xf32> -> vector<8x128xf32>
    %57 = arith.addf %54, %56 : vector<8x128xf32>
    %58 = vector.extract_strided_slice %57 {offsets = [0, 0], sizes = [8, 32], strides = [1, 1]} : vector<8x128xf32> to vector<8x32xf32>
    %59 = arith.negf %58 : vector<8x32xf32>
    %60 = math.exp %59 : vector<8x32xf32>
    %cst_38 = arith.constant 1.000000e+00 : f32
    %61 = vector.broadcast %cst_38 : f32 to vector<8x32xf32>
    %62 = arith.addf %61, %60 : vector<8x32xf32>
    %63 = arith.divf %61, %62 : vector<8x32xf32>
    %64 = vector.extract_strided_slice %57 {offsets = [0, 32], sizes = [8, 32], strides = [1, 1]} : vector<8x128xf32> to vector<8x32xf32>
    %65 = arith.negf %64 : vector<8x32xf32>
    %66 = math.exp %65 : vector<8x32xf32>
    %cst_39 = arith.constant 1.000000e+00 : f32
    %67 = vector.broadcast %cst_39 : f32 to vector<8x32xf32>
    %68 = arith.addf %67, %66 : vector<8x32xf32>
    %69 = arith.divf %67, %68 : vector<8x32xf32>
    %70 = vector.extract_strided_slice %57 {offsets = [0, 64], sizes = [8, 32], strides = [1, 1]} : vector<8x128xf32> to vector<8x32xf32>
    %71 = math.tanh %70 : vector<8x32xf32>
    %72 = vector.extract_strided_slice %57 {offsets = [0, 96], sizes = [8, 32], strides = [1, 1]} : vector<8x128xf32> to vector<8x32xf32>
    %73 = arith.negf %72 : vector<8x32xf32>
    %74 = math.exp %73 : vector<8x32xf32>
    %cst_40 = arith.constant 1.000000e+00 : f32
    %75 = vector.broadcast %cst_40 : f32 to vector<8x32xf32>
    %76 = arith.addf %75, %74 : vector<8x32xf32>
    %77 = arith.divf %75, %76 : vector<8x32xf32>
    %c0_41 = arith.constant 0 : index
    %c0_42 = arith.constant 0 : index
    %78 = vector.load %arg13[%c0_41, %c0_42] : memref<8x32xf32, #tpu.memory_space<vmem>>, vector<8x32xf32>
    %79 = arith.mulf %69, %78 : vector<8x32xf32>
    %80 = arith.mulf %63, %71 : vector<8x32xf32>
    %81 = arith.addf %79, %80 : vector<8x32xf32>
    %82 = math.tanh %81 : vector<8x32xf32>
    %83 = arith.mulf %77, %82 : vector<8x32xf32>
    %c0_43 = arith.constant 0 : index
    %c0_44 = arith.constant 0 : index
    %84 = vector.load %arg13[%c0_43, %c0_44] : memref<8x32xf32, #tpu.memory_space<vmem>>, vector<8x32xf32>
    tpu.vector_store %arg13[%c0_43, %c0_44], %81 {strides = array<i32>} : memref<8x32xf32, #tpu.memory_space<vmem>>, vector<8x32xf32>,
    %c0_45 = arith.constant 0 : index
    %c0_46 = arith.constant 0 : index
    %85 = vector.load %arg12[%c0_45, %c0_46] : memref<8x32xf32, #tpu.memory_space<vmem>>, vector<8x32xf32>
    tpu.vector_store %arg12[%c0_45, %c0_46], %83 {strides = array<i32>} : memref<8x32xf32, #tpu.memory_space<vmem>>, vector<8x32xf32>,
    %86 = arith.index_cast %c1_i32 : i32 to index
    %c0_47 = arith.constant 0 : index
    %c0_48 = arith.constant 0 : index
    %87 = vector.load %arg10[%86, %c0_47, %c0_48] : memref<8x8x32xf32, #tpu.memory_space<vmem>>, vector<1x8x32xf32>
    %88 = vector.shape_cast %87 : vector<1x8x32xf32> to vector<8x32xf32>
    %89 = vector.shape_cast %83 : vector<8x32xf32> to vector<1x8x32xf32>
    tpu.vector_store %arg10[%86, %c0_47, %c0_48], %89 {strides = array<i32>} : memref<8x8x32xf32, #tpu.memory_space<vmem>>, vector<1x8x32xf32>,
    %c2_i32 = arith.constant 2 : i32
    %90 = arith.index_cast %c2_i32 : i32 to index
    %c0_49 = arith.constant 0 : index
    %c0_50 = arith.constant 0 : index
    %91 = vector.load %arg11[%90, %c0_49, %c0_50] : memref<8x8x128xf32, #tpu.memory_space<vmem>>, vector<1x8x128xf32>
    %92 = vector.shape_cast %91 : vector<1x8x128xf32> to vector<8x128xf32>
    %c0_51 = arith.constant 0 : index
    %c0_52 = arith.constant 0 : index
    %93 = vector.load %arg12[%c0_51, %c0_52] : memref<8x32xf32, #tpu.memory_space<vmem>>, vector<8x32xf32>
    %cst_53 = arith.constant dense<0.000000e+00> : vector<8x128xf32>
    %94 = tpu.matmul %93, %1, %cst_53 {dimension_numbers = #tpu.dot_dimension_numbers<[1], [0], [0], [1], [0, 0, 1, 1], [], []>} : vector<8x32xf32>, vector<32x128xf32>, vector<8x128xf32> -> vector<8x128xf32>
    %95 = arith.addf %92, %94 : vector<8x128xf32>
    %96 = vector.extract_strided_slice %95 {offsets = [0, 0], sizes = [8, 32], strides = [1, 1]} : vector<8x128xf32> to vector<8x32xf32>
    %97 = arith.negf %96 : vector<8x32xf32>
    %98 = math.exp %97 : vector<8x32xf32>
    %cst_54 = arith.constant 1.000000e+00 : f32
    %99 = vector.broadcast %cst_54 : f32 to vector<8x32xf32>
    %100 = arith.addf %99, %98 : vector<8x32xf32>
    %101 = arith.divf %99, %100 : vector<8x32xf32>
    %102 = vector.extract_strided_slice %95 {offsets = [0, 32], sizes = [8, 32], strides = [1, 1]} : vector<8x128xf32> to vector<8x32xf32>
    %103 = arith.negf %102 : vector<8x32xf32>
    %104 = math.exp %103 : vector<8x32xf32>
    %cst_55 = arith.constant 1.000000e+00 : f32
    %105 = vector.broadcast %cst_55 : f32 to vector<8x32xf32>
    %106 = arith.addf %105, %104 : vector<8x32xf32>
    %107 = arith.divf %105, %106 : vector<8x32xf32>
    %108 = vector.extract_strided_slice %95 {offsets = [0, 64], sizes = [8, 32], strides = [1, 1]} : vector<8x128xf32> to vector<8x32xf32>
    %109 = math.tanh %108 : vector<8x32xf32>
    %110 = vector.extract_strided_slice %95 {offsets = [0, 96], sizes = [8, 32], strides = [1, 1]} : vector<8x128xf32> to vector<8x32xf32>
    %111 = arith.negf %110 : vector<8x32xf32>
    %112 = math.exp %111 : vector<8x32xf32>
    %cst_56 = arith.constant 1.000000e+00 : f32
    %113 = vector.broadcast %cst_56 : f32 to vector<8x32xf32>
    %114 = arith.addf %113, %112 : vector<8x32xf32>
    %115 = arith.divf %113, %114 : vector<8x32xf32>
    %c0_57 = arith.constant 0 : index
    %c0_58 = arith.constant 0 : index
    %116 = vector.load %arg13[%c0_57, %c0_58] : memref<8x32xf32, #tpu.memory_space<vmem>>, vector<8x32xf32>
    %117 = arith.mulf %107, %116 : vector<8x32xf32>
    %118 = arith.mulf %101, %109 : vector<8x32xf32>
    %119 = arith.addf %117, %118 : vector<8x32xf32>
    %120 = math.tanh %119 : vector<8x32xf32>
    %121 = arith.mulf %115, %120 : vector<8x32xf32>
    %c0_59 = arith.constant 0 : index
    %c0_60 = arith.constant 0 : index
    %122 = vector.load %arg13[%c0_59, %c0_60] : memref<8x32xf32, #tpu.memory_space<vmem>>, vector<8x32xf32>
    tpu.vector_store %arg13[%c0_59, %c0_60], %119 {strides = array<i32>} : memref<8x32xf32, #tpu.memory_space<vmem>>, vector<8x32xf32>,
    %c0_61 = arith.constant 0 : index
    %c0_62 = arith.constant 0 : index
    %123 = vector.load %arg12[%c0_61, %c0_62] : memref<8x32xf32, #tpu.memory_space<vmem>>, vector<8x32xf32>
    tpu.vector_store %arg12[%c0_61, %c0_62], %121 {strides = array<i32>} : memref<8x32xf32, #tpu.memory_space<vmem>>, vector<8x32xf32>,
    %124 = arith.index_cast %c2_i32 : i32 to index
    %c0_63 = arith.constant 0 : index
    %c0_64 = arith.constant 0 : index
    %125 = vector.load %arg10[%124, %c0_63, %c0_64] : memref<8x8x32xf32, #tpu.memory_space<vmem>>, vector<1x8x32xf32>
    %126 = vector.shape_cast %125 : vector<1x8x32xf32> to vector<8x32xf32>
    %127 = vector.shape_cast %121 : vector<8x32xf32> to vector<1x8x32xf32>
    tpu.vector_store %arg10[%124, %c0_63, %c0_64], %127 {strides = array<i32>} : memref<8x8x32xf32, #tpu.memory_space<vmem>>, vector<1x8x32xf32>,
    %c3_i32 = arith.constant 3 : i32
    %128 = arith.index_cast %c3_i32 : i32 to index
    %c0_65 = arith.constant 0 : index
    %c0_66 = arith.constant 0 : index
    %129 = vector.load %arg11[%128, %c0_65, %c0_66] : memref<8x8x128xf32, #tpu.memory_space<vmem>>, vector<1x8x128xf32>
    %130 = vector.shape_cast %129 : vector<1x8x128xf32> to vector<8x128xf32>
    %c0_67 = arith.constant 0 : index
    %c0_68 = arith.constant 0 : index
    %131 = vector.load %arg12[%c0_67, %c0_68] : memref<8x32xf32, #tpu.memory_space<vmem>>, vector<8x32xf32>
    %cst_69 = arith.constant dense<0.000000e+00> : vector<8x128xf32>
    %132 = tpu.matmul %131, %1, %cst_69 {dimension_numbers = #tpu.dot_dimension_numbers<[1], [0], [0], [1], [0, 0, 1, 1], [], []>} : vector<8x32xf32>, vector<32x128xf32>, vector<8x128xf32> -> vector<8x128xf32>
    %133 = arith.addf %130, %132 : vector<8x128xf32>
    %134 = vector.extract_strided_slice %133 {offsets = [0, 0], sizes = [8, 32], strides = [1, 1]} : vector<8x128xf32> to vector<8x32xf32>
    %135 = arith.negf %134 : vector<8x32xf32>
    %136 = math.exp %135 : vector<8x32xf32>
    %cst_70 = arith.constant 1.000000e+00 : f32
    %137 = vector.broadcast %cst_70 : f32 to vector<8x32xf32>
    %138 = arith.addf %137, %136 : vector<8x32xf32>
    %139 = arith.divf %137, %138 : vector<8x32xf32>
    %140 = vector.extract_strided_slice %133 {offsets = [0, 32], sizes = [8, 32], strides = [1, 1]} : vector<8x128xf32> to vector<8x32xf32>
    %141 = arith.negf %140 : vector<8x32xf32>
    %142 = math.exp %141 : vector<8x32xf32>
    %cst_71 = arith.constant 1.000000e+00 : f32
    %143 = vector.broadcast %cst_71 : f32 to vector<8x32xf32>
    %144 = arith.addf %143, %142 : vector<8x32xf32>
    %145 = arith.divf %143, %144 : vector<8x32xf32>
    %146 = vector.extract_strided_slice %133 {offsets = [0, 64], sizes = [8, 32], strides = [1, 1]} : vector<8x128xf32> to vector<8x32xf32>
    %147 = math.tanh %146 : vector<8x32xf32>
    %148 = vector.extract_strided_slice %133 {offsets = [0, 96], sizes = [8, 32], strides = [1, 1]} : vector<8x128xf32> to vector<8x32xf32>
    %149 = arith.negf %148 : vector<8x32xf32>
    %150 = math.exp %149 : vector<8x32xf32>
    %cst_72 = arith.constant 1.000000e+00 : f32
    %151 = vector.broadcast %cst_72 : f32 to vector<8x32xf32>
    %152 = arith.addf %151, %150 : vector<8x32xf32>
    %153 = arith.divf %151, %152 : vector<8x32xf32>
    %c0_73 = arith.constant 0 : index
    %c0_74 = arith.constant 0 : index
    %154 = vector.load %arg13[%c0_73, %c0_74] : memref<8x32xf32, #tpu.memory_space<vmem>>, vector<8x32xf32>
    %155 = arith.mulf %145, %154 : vector<8x32xf32>
    %156 = arith.mulf %139, %147 : vector<8x32xf32>
    %157 = arith.addf %155, %156 : vector<8x32xf32>
    %158 = math.tanh %157 : vector<8x32xf32>
    %159 = arith.mulf %153, %158 : vector<8x32xf32>
    %c0_75 = arith.constant 0 : index
    %c0_76 = arith.constant 0 : index
    %160 = vector.load %arg13[%c0_75, %c0_76] : memref<8x32xf32, #tpu.memory_space<vmem>>, vector<8x32xf32>
    tpu.vector_store %arg13[%c0_75, %c0_76], %157 {strides = array<i32>} : memref<8x32xf32, #tpu.memory_space<vmem>>, vector<8x32xf32>,
    %c0_77 = arith.constant 0 : index
    %c0_78 = arith.constant 0 : index
    %161 = vector.load %arg12[%c0_77, %c0_78] : memref<8x32xf32, #tpu.memory_space<vmem>>, vector<8x32xf32>
    tpu.vector_store %arg12[%c0_77, %c0_78], %159 {strides = array<i32>} : memref<8x32xf32, #tpu.memory_space<vmem>>, vector<8x32xf32>,
    %162 = arith.index_cast %c3_i32 : i32 to index
    %c0_79 = arith.constant 0 : index
    %c0_80 = arith.constant 0 : index
    %163 = vector.load %arg10[%162, %c0_79, %c0_80] : memref<8x8x32xf32, #tpu.memory_space<vmem>>, vector<1x8x32xf32>
    %164 = vector.shape_cast %163 : vector<1x8x32xf32> to vector<8x32xf32>
    %165 = vector.shape_cast %159 : vector<8x32xf32> to vector<1x8x32xf32>
    tpu.vector_store %arg10[%162, %c0_79, %c0_80], %165 {strides = array<i32>} : memref<8x8x32xf32, #tpu.memory_space<vmem>>, vector<1x8x32xf32>,
    %c4_i32 = arith.constant 4 : i32
    %166 = arith.index_cast %c4_i32 : i32 to index
    %c0_81 = arith.constant 0 : index
    %c0_82 = arith.constant 0 : index
    %167 = vector.load %arg11[%166, %c0_81, %c0_82] : memref<8x8x128xf32, #tpu.memory_space<vmem>>, vector<1x8x128xf32>
    %168 = vector.shape_cast %167 : vector<1x8x128xf32> to vector<8x128xf32>
    %c0_83 = arith.constant 0 : index
    %c0_84 = arith.constant 0 : index
    %169 = vector.load %arg12[%c0_83, %c0_84] : memref<8x32xf32, #tpu.memory_space<vmem>>, vector<8x32xf32>
    %cst_85 = arith.constant dense<0.000000e+00> : vector<8x128xf32>
    %170 = tpu.matmul %169, %1, %cst_85 {dimension_numbers = #tpu.dot_dimension_numbers<[1], [0], [0], [1], [0, 0, 1, 1], [], []>} : vector<8x32xf32>, vector<32x128xf32>, vector<8x128xf32> -> vector<8x128xf32>
    %171 = arith.addf %168, %170 : vector<8x128xf32>
    %172 = vector.extract_strided_slice %171 {offsets = [0, 0], sizes = [8, 32], strides = [1, 1]} : vector<8x128xf32> to vector<8x32xf32>
    %173 = arith.negf %172 : vector<8x32xf32>
    %174 = math.exp %173 : vector<8x32xf32>
    %cst_86 = arith.constant 1.000000e+00 : f32
    %175 = vector.broadcast %cst_86 : f32 to vector<8x32xf32>
    %176 = arith.addf %175, %174 : vector<8x32xf32>
    %177 = arith.divf %175, %176 : vector<8x32xf32>
    %178 = vector.extract_strided_slice %171 {offsets = [0, 32], sizes = [8, 32], strides = [1, 1]} : vector<8x128xf32> to vector<8x32xf32>
    %179 = arith.negf %178 : vector<8x32xf32>
    %180 = math.exp %179 : vector<8x32xf32>
    %cst_87 = arith.constant 1.000000e+00 : f32
    %181 = vector.broadcast %cst_87 : f32 to vector<8x32xf32>
    %182 = arith.addf %181, %180 : vector<8x32xf32>
    %183 = arith.divf %181, %182 : vector<8x32xf32>
    %184 = vector.extract_strided_slice %171 {offsets = [0, 64], sizes = [8, 32], strides = [1, 1]} : vector<8x128xf32> to vector<8x32xf32>
    %185 = math.tanh %184 : vector<8x32xf32>
    %186 = vector.extract_strided_slice %171 {offsets = [0, 96], sizes = [8, 32], strides = [1, 1]} : vector<8x128xf32> to vector<8x32xf32>
    %187 = arith.negf %186 : vector<8x32xf32>
    %188 = math.exp %187 : vector<8x32xf32>
    %cst_88 = arith.constant 1.000000e+00 : f32
    %189 = vector.broadcast %cst_88 : f32 to vector<8x32xf32>
    %190 = arith.addf %189, %188 : vector<8x32xf32>
    %191 = arith.divf %189, %190 : vector<8x32xf32>
    %c0_89 = arith.constant 0 : index
    %c0_90 = arith.constant 0 : index
    %192 = vector.load %arg13[%c0_89, %c0_90] : memref<8x32xf32, #tpu.memory_space<vmem>>, vector<8x32xf32>
    %193 = arith.mulf %183, %192 : vector<8x32xf32>
    %194 = arith.mulf %177, %185 : vector<8x32xf32>
    %195 = arith.addf %193, %194 : vector<8x32xf32>
    %196 = math.tanh %195 : vector<8x32xf32>
    %197 = arith.mulf %191, %196 : vector<8x32xf32>
    %c0_91 = arith.constant 0 : index
    %c0_92 = arith.constant 0 : index
    %198 = vector.load %arg13[%c0_91, %c0_92] : memref<8x32xf32, #tpu.memory_space<vmem>>, vector<8x32xf32>
    tpu.vector_store %arg13[%c0_91, %c0_92], %195 {strides = array<i32>} : memref<8x32xf32, #tpu.memory_space<vmem>>, vector<8x32xf32>,
    %c0_93 = arith.constant 0 : index
    %c0_94 = arith.constant 0 : index
    %199 = vector.load %arg12[%c0_93, %c0_94] : memref<8x32xf32, #tpu.memory_space<vmem>>, vector<8x32xf32>
    tpu.vector_store %arg12[%c0_93, %c0_94], %197 {strides = array<i32>} : memref<8x32xf32, #tpu.memory_space<vmem>>, vector<8x32xf32>,
    %200 = arith.index_cast %c4_i32 : i32 to index
    %c0_95 = arith.constant 0 : index
    %c0_96 = arith.constant 0 : index
    %201 = vector.load %arg10[%200, %c0_95, %c0_96] : memref<8x8x32xf32, #tpu.memory_space<vmem>>, vector<1x8x32xf32>
    %202 = vector.shape_cast %201 : vector<1x8x32xf32> to vector<8x32xf32>
    %203 = vector.shape_cast %197 : vector<8x32xf32> to vector<1x8x32xf32>
    tpu.vector_store %arg10[%200, %c0_95, %c0_96], %203 {strides = array<i32>} : memref<8x8x32xf32, #tpu.memory_space<vmem>>, vector<1x8x32xf32>,
    %c5_i32 = arith.constant 5 : i32
    %204 = arith.index_cast %c5_i32 : i32 to index
    %c0_97 = arith.constant 0 : index
    %c0_98 = arith.constant 0 : index
    %205 = vector.load %arg11[%204, %c0_97, %c0_98] : memref<8x8x128xf32, #tpu.memory_space<vmem>>, vector<1x8x128xf32>
    %206 = vector.shape_cast %205 : vector<1x8x128xf32> to vector<8x128xf32>
    %c0_99 = arith.constant 0 : index
    %c0_100 = arith.constant 0 : index
    %207 = vector.load %arg12[%c0_99, %c0_100] : memref<8x32xf32, #tpu.memory_space<vmem>>, vector<8x32xf32>
    %cst_101 = arith.constant dense<0.000000e+00> : vector<8x128xf32>
    %208 = tpu.matmul %207, %1, %cst_101 {dimension_numbers = #tpu.dot_dimension_numbers<[1], [0], [0], [1], [0, 0, 1, 1], [], []>} : vector<8x32xf32>, vector<32x128xf32>, vector<8x128xf32> -> vector<8x128xf32>
    %209 = arith.addf %206, %208 : vector<8x128xf32>
    %210 = vector.extract_strided_slice %209 {offsets = [0, 0], sizes = [8, 32], strides = [1, 1]} : vector<8x128xf32> to vector<8x32xf32>
    %211 = arith.negf %210 : vector<8x32xf32>
    %212 = math.exp %211 : vector<8x32xf32>
    %cst_102 = arith.constant 1.000000e+00 : f32
    %213 = vector.broadcast %cst_102 : f32 to vector<8x32xf32>
    %214 = arith.addf %213, %212 : vector<8x32xf32>
    %215 = arith.divf %213, %214 : vector<8x32xf32>
    %216 = vector.extract_strided_slice %209 {offsets = [0, 32], sizes = [8, 32], strides = [1, 1]} : vector<8x128xf32> to vector<8x32xf32>
    %217 = arith.negf %216 : vector<8x32xf32>
    %218 = math.exp %217 : vector<8x32xf32>
    %cst_103 = arith.constant 1.000000e+00 : f32
    %219 = vector.broadcast %cst_103 : f32 to vector<8x32xf32>
    %220 = arith.addf %219, %218 : vector<8x32xf32>
    %221 = arith.divf %219, %220 : vector<8x32xf32>
    %222 = vector.extract_strided_slice %209 {offsets = [0, 64], sizes = [8, 32], strides = [1, 1]} : vector<8x128xf32> to vector<8x32xf32>
    %223 = math.tanh %222 : vector<8x32xf32>
    %224 = vector.extract_strided_slice %209 {offsets = [0, 96], sizes = [8, 32], strides = [1, 1]} : vector<8x128xf32> to vector<8x32xf32>
    %225 = arith.negf %224 : vector<8x32xf32>
    %226 = math.exp %225 : vector<8x32xf32>
    %cst_104 = arith.constant 1.000000e+00 : f32
    %227 = vector.broadcast %cst_104 : f32 to vector<8x32xf32>
    %228 = arith.addf %227, %226 : vector<8x32xf32>
    %229 = arith.divf %227, %228 : vector<8x32xf32>
    %c0_105 = arith.constant 0 : index
    %c0_106 = arith.constant 0 : index
    %230 = vector.load %arg13[%c0_105, %c0_106] : memref<8x32xf32, #tpu.memory_space<vmem>>, vector<8x32xf32>
    %231 = arith.mulf %221, %230 : vector<8x32xf32>
    %232 = arith.mulf %215, %223 : vector<8x32xf32>
    %233 = arith.addf %231, %232 : vector<8x32xf32>
    %234 = math.tanh %233 : vector<8x32xf32>
    %235 = arith.mulf %229, %234 : vector<8x32xf32>
    %c0_107 = arith.constant 0 : index
    %c0_108 = arith.constant 0 : index
    %236 = vector.load %arg13[%c0_107, %c0_108] : memref<8x32xf32, #tpu.memory_space<vmem>>, vector<8x32xf32>
    tpu.vector_store %arg13[%c0_107, %c0_108], %233 {strides = array<i32>} : memref<8x32xf32, #tpu.memory_space<vmem>>, vector<8x32xf32>,
    %c0_109 = arith.constant 0 : index
    %c0_110 = arith.constant 0 : index
    %237 = vector.load %arg12[%c0_109, %c0_110] : memref<8x32xf32, #tpu.memory_space<vmem>>, vector<8x32xf32>
    tpu.vector_store %arg12[%c0_109, %c0_110], %235 {strides = array<i32>} : memref<8x32xf32, #tpu.memory_space<vmem>>, vector<8x32xf32>,
    %238 = arith.index_cast %c5_i32 : i32 to index
    %c0_111 = arith.constant 0 : index
    %c0_112 = arith.constant 0 : index
    %239 = vector.load %arg10[%238, %c0_111, %c0_112] : memref<8x8x32xf32, #tpu.memory_space<vmem>>, vector<1x8x32xf32>
    %240 = vector.shape_cast %239 : vector<1x8x32xf32> to vector<8x32xf32>
    %241 = vector.shape_cast %235 : vector<8x32xf32> to vector<1x8x32xf32>
    tpu.vector_store %arg10[%238, %c0_111, %c0_112], %241 {strides = array<i32>} : memref<8x8x32xf32, #tpu.memory_space<vmem>>, vector<1x8x32xf32>,
    %c6_i32 = arith.constant 6 : i32
    %242 = arith.index_cast %c6_i32 : i32 to index
    %c0_113 = arith.constant 0 : index
    %c0_114 = arith.constant 0 : index
    %243 = vector.load %arg11[%242, %c0_113, %c0_114] : memref<8x8x128xf32, #tpu.memory_space<vmem>>, vector<1x8x128xf32>
    %244 = vector.shape_cast %243 : vector<1x8x128xf32> to vector<8x128xf32>
    %c0_115 = arith.constant 0 : index
    %c0_116 = arith.constant 0 : index
    %245 = vector.load %arg12[%c0_115, %c0_116] : memref<8x32xf32, #tpu.memory_space<vmem>>, vector<8x32xf32>
    %cst_117 = arith.constant dense<0.000000e+00> : vector<8x128xf32>
    %246 = tpu.matmul %245, %1, %cst_117 {dimension_numbers = #tpu.dot_dimension_numbers<[1], [0], [0], [1], [0, 0, 1, 1], [], []>} : vector<8x32xf32>, vector<32x128xf32>, vector<8x128xf32> -> vector<8x128xf32>
    %247 = arith.addf %244, %246 : vector<8x128xf32>
    %248 = vector.extract_strided_slice %247 {offsets = [0, 0], sizes = [8, 32], strides = [1, 1]} : vector<8x128xf32> to vector<8x32xf32>
    %249 = arith.negf %248 : vector<8x32xf32>
    %250 = math.exp %249 : vector<8x32xf32>
    %cst_118 = arith.constant 1.000000e+00 : f32
    %251 = vector.broadcast %cst_118 : f32 to vector<8x32xf32>
    %252 = arith.addf %251, %250 : vector<8x32xf32>
    %253 = arith.divf %251, %252 : vector<8x32xf32>
    %254 = vector.extract_strided_slice %247 {offsets = [0, 32], sizes = [8, 32], strides = [1, 1]} : vector<8x128xf32> to vector<8x32xf32>
    %255 = arith.negf %254 : vector<8x32xf32>
    %256 = math.exp %255 : vector<8x32xf32>
    %cst_119 = arith.constant 1.000000e+00 : f32
    %257 = vector.broadcast %cst_119 : f32 to vector<8x32xf32>
    %258 = arith.addf %257, %256 : vector<8x32xf32>
    %259 = arith.divf %257, %258 : vector<8x32xf32>
    %260 = vector.extract_strided_slice %247 {offsets = [0, 64], sizes = [8, 32], strides = [1, 1]} : vector<8x128xf32> to vector<8x32xf32>
    %261 = math.tanh %260 : vector<8x32xf32>
    %262 = vector.extract_strided_slice %247 {offsets = [0, 96], sizes = [8, 32], strides = [1, 1]} : vector<8x128xf32> to vector<8x32xf32>
    %263 = arith.negf %262 : vector<8x32xf32>
    %264 = math.exp %263 : vector<8x32xf32>
    %cst_120 = arith.constant 1.000000e+00 : f32
    %265 = vector.broadcast %cst_120 : f32 to vector<8x32xf32>
    %266 = arith.addf %265, %264 : vector<8x32xf32>
    %267 = arith.divf %265, %266 : vector<8x32xf32>
    %c0_121 = arith.constant 0 : index
    %c0_122 = arith.constant 0 : index
    %268 = vector.load %arg13[%c0_121, %c0_122] : memref<8x32xf32, #tpu.memory_space<vmem>>, vector<8x32xf32>
    %269 = arith.mulf %259, %268 : vector<8x32xf32>
    %270 = arith.mulf %253, %261 : vector<8x32xf32>
    %271 = arith.addf %269, %270 : vector<8x32xf32>
    %272 = math.tanh %271 : vector<8x32xf32>
    %273 = arith.mulf %267, %272 : vector<8x32xf32>
    %c0_123 = arith.constant 0 : index
    %c0_124 = arith.constant 0 : index
    %274 = vector.load %arg13[%c0_123, %c0_124] : memref<8x32xf32, #tpu.memory_space<vmem>>, vector<8x32xf32>
    tpu.vector_store %arg13[%c0_123, %c0_124], %271 {strides = array<i32>} : memref<8x32xf32, #tpu.memory_space<vmem>>, vector<8x32xf32>,
    %c0_125 = arith.constant 0 : index
    %c0_126 = arith.constant 0 : index
    %275 = vector.load %arg12[%c0_125, %c0_126] : memref<8x32xf32, #tpu.memory_space<vmem>>, vector<8x32xf32>
    tpu.vector_store %arg12[%c0_125, %c0_126], %273 {strides = array<i32>} : memref<8x32xf32, #tpu.memory_space<vmem>>, vector<8x32xf32>,
    %276 = arith.index_cast %c6_i32 : i32 to index
    %c0_127 = arith.constant 0 : index
    %c0_128 = arith.constant 0 : index
    %277 = vector.load %arg10[%276, %c0_127, %c0_128] : memref<8x8x32xf32, #tpu.memory_space<vmem>>, vector<1x8x32xf32>
    %278 = vector.shape_cast %277 : vector<1x8x32xf32> to vector<8x32xf32>
    %279 = vector.shape_cast %273 : vector<8x32xf32> to vector<1x8x32xf32>
    tpu.vector_store %arg10[%276, %c0_127, %c0_128], %279 {strides = array<i32>} : memref<8x8x32xf32, #tpu.memory_space<vmem>>, vector<1x8x32xf32>,
    %c7_i32 = arith.constant 7 : i32
    %280 = arith.index_cast %c7_i32 : i32 to index
    %c0_129 = arith.constant 0 : index
    %c0_130 = arith.constant 0 : index
    %281 = vector.load %arg11[%280, %c0_129, %c0_130] : memref<8x8x128xf32, #tpu.memory_space<vmem>>, vector<1x8x128xf32>
    %282 = vector.shape_cast %281 : vector<1x8x128xf32> to vector<8x128xf32>
    %c0_131 = arith.constant 0 : index
    %c0_132 = arith.constant 0 : index
    %283 = vector.load %arg12[%c0_131, %c0_132] : memref<8x32xf32, #tpu.memory_space<vmem>>, vector<8x32xf32>
    %cst_133 = arith.constant dense<0.000000e+00> : vector<8x128xf32>
    %284 = tpu.matmul %283, %1, %cst_133 {dimension_numbers = #tpu.dot_dimension_numbers<[1], [0], [0], [1], [0, 0, 1, 1], [], []>} : vector<8x32xf32>, vector<32x128xf32>, vector<8x128xf32> -> vector<8x128xf32>
    %285 = arith.addf %282, %284 : vector<8x128xf32>
    %286 = vector.extract_strided_slice %285 {offsets = [0, 0], sizes = [8, 32], strides = [1, 1]} : vector<8x128xf32> to vector<8x32xf32>
    %287 = arith.negf %286 : vector<8x32xf32>
    %288 = math.exp %287 : vector<8x32xf32>
    %cst_134 = arith.constant 1.000000e+00 : f32
    %289 = vector.broadcast %cst_134 : f32 to vector<8x32xf32>
    %290 = arith.addf %289, %288 : vector<8x32xf32>
    %291 = arith.divf %289, %290 : vector<8x32xf32>
    %292 = vector.extract_strided_slice %285 {offsets = [0, 32], sizes = [8, 32], strides = [1, 1]} : vector<8x128xf32> to vector<8x32xf32>
    %293 = arith.negf %292 : vector<8x32xf32>
    %294 = math.exp %293 : vector<8x32xf32>
    %cst_135 = arith.constant 1.000000e+00 : f32
    %295 = vector.broadcast %cst_135 : f32 to vector<8x32xf32>
    %296 = arith.addf %295, %294 : vector<8x32xf32>
    %297 = arith.divf %295, %296 : vector<8x32xf32>
    %298 = vector.extract_strided_slice %285 {offsets = [0, 64], sizes = [8, 32], strides = [1, 1]} : vector<8x128xf32> to vector<8x32xf32>
    %299 = math.tanh %298 : vector<8x32xf32>
    %300 = vector.extract_strided_slice %285 {offsets = [0, 96], sizes = [8, 32], strides = [1, 1]} : vector<8x128xf32> to vector<8x32xf32>
    %301 = arith.negf %300 : vector<8x32xf32>
    %302 = math.exp %301 : vector<8x32xf32>
    %cst_136 = arith.constant 1.000000e+00 : f32
    %303 = vector.broadcast %cst_136 : f32 to vector<8x32xf32>
    %304 = arith.addf %303, %302 : vector<8x32xf32>
    %305 = arith.divf %303, %304 : vector<8x32xf32>
    %c0_137 = arith.constant 0 : index
    %c0_138 = arith.constant 0 : index
    %306 = vector.load %arg13[%c0_137, %c0_138] : memref<8x32xf32, #tpu.memory_space<vmem>>, vector<8x32xf32>
    %307 = arith.mulf %297, %306 : vector<8x32xf32>
    %308 = arith.mulf %291, %299 : vector<8x32xf32>
    %309 = arith.addf %307, %308 : vector<8x32xf32>
    %310 = math.tanh %309 : vector<8x32xf32>
    %311 = arith.mulf %305, %310 : vector<8x32xf32>
    %c0_139 = arith.constant 0 : index
    %c0_140 = arith.constant 0 : index
    %312 = vector.load %arg13[%c0_139, %c0_140] : memref<8x32xf32, #tpu.memory_space<vmem>>, vector<8x32xf32>
    tpu.vector_store %arg13[%c0_139, %c0_140], %309 {strides = array<i32>} : memref<8x32xf32, #tpu.memory_space<vmem>>, vector<8x32xf32>,
    %c0_141 = arith.constant 0 : index
    %c0_142 = arith.constant 0 : index
    %313 = vector.load %arg12[%c0_141, %c0_142] : memref<8x32xf32, #tpu.memory_space<vmem>>, vector<8x32xf32>
    tpu.vector_store %arg12[%c0_141, %c0_142], %311 {strides = array<i32>} : memref<8x32xf32, #tpu.memory_space<vmem>>, vector<8x32xf32>,
    %314 = arith.index_cast %c7_i32 : i32 to index
    %c0_143 = arith.constant 0 : index
    %c0_144 = arith.constant 0 : index
    %315 = vector.load %arg10[%314, %c0_143, %c0_144] : memref<8x8x32xf32, #tpu.memory_space<vmem>>, vector<1x8x32xf32>
    %316 = vector.shape_cast %315 : vector<1x8x32xf32> to vector<8x32xf32>
    %317 = vector.shape_cast %311 : vector<8x32xf32> to vector<1x8x32xf32>
    tpu.vector_store %arg10[%314, %c0_143, %c0_144], %317 {strides = array<i32>} : memref<8x8x32xf32, #tpu.memory_space<vmem>>, vector<1x8x32xf32>,
    %c8_i32 = arith.constant 8 : i32
    %c0_145 = arith.constant 0 : index
    %c0_146 = arith.constant 0 : index
    %318 = vector.load %arg4[%c0_145, %c0_146] : memref<32x128xf32, #tpu.memory_space<vmem>>, vector<32x128xf32>
    %c0_147 = arith.constant 0 : index
    %c0_148 = arith.constant 0 : index
    %319 = vector.load %arg5[%c0_147, %c0_148] : memref<32x128xf32, #tpu.memory_space<vmem>>, vector<32x128xf32>
    %c0_149 = arith.constant 0 : index
    %c0_150 = arith.constant 0 : index
    %320 = vector.load %arg6[%c0_149, %c0_150] : memref<1x128xf32, #tpu.memory_space<vmem>>, vector<1x128xf32>
    %c0_151 = arith.constant 0 : index
    %c0_152 = arith.constant 0 : index
    %c0_153 = arith.constant 0 : index
    %321 = vector.load %arg10[%c0_151, %c0_152, %c0_153] : memref<8x8x32xf32, #tpu.memory_space<vmem>>, vector<8x8x32xf32>
    %322 = vector.shape_cast %321 : vector<8x8x32xf32> to vector<64x32xf32>
    %cst_154 = arith.constant dense<0.000000e+00> : vector<64x128xf32>
    %323 = tpu.matmul %322, %318, %cst_154 {dimension_numbers = #tpu.dot_dimension_numbers<[1], [0], [0], [1], [0, 0, 1, 1], [], []>} : vector<64x32xf32>, vector<32x128xf32>, vector<64x128xf32> -> vector<64x128xf32>
    %324 = vector.broadcast %320 : vector<1x128xf32> to vector<64x128xf32>
    %325 = arith.addf %323, %324 : vector<64x128xf32>
    %326 = vector.shape_cast %325 : vector<64x128xf32> to vector<8x8x128xf32>
    %c0_155 = arith.constant 0 : index
    %c0_156 = arith.constant 0 : index
    %c0_157 = arith.constant 0 : index
    %327 = vector.load %arg11[%c0_155, %c0_156, %c0_157] : memref<8x8x128xf32, #tpu.memory_space<vmem>>, vector<8x8x128xf32>
    tpu.vector_store %arg11[%c0_155, %c0_156, %c0_157], %326 {strides = array<i32>} : memref<8x8x128xf32, #tpu.memory_space<vmem>>, vector<8x8x128xf32>,
    %cst_158 = arith.constant 0.000000e+00 : f32
    %328 = vector.broadcast %cst_158 : f32 to vector<8x32xf32>
    %c0_159 = arith.constant 0 : index
    %c0_160 = arith.constant 0 : index
    %329 = vector.load %arg12[%c0_159, %c0_160] : memref<8x32xf32, #tpu.memory_space<vmem>>, vector<8x32xf32>
    tpu.vector_store %arg12[%c0_159, %c0_160], %328 {strides = array<i32>} : memref<8x32xf32, #tpu.memory_space<vmem>>, vector<8x32xf32>,
    %cst_161 = arith.constant 0.000000e+00 : f32
    %330 = vector.broadcast %cst_161 : f32 to vector<8x32xf32>
    %c0_162 = arith.constant 0 : index
    %c0_163 = arith.constant 0 : index
    %331 = vector.load %arg13[%c0_162, %c0_163] : memref<8x32xf32, #tpu.memory_space<vmem>>, vector<8x32xf32>
    tpu.vector_store %arg13[%c0_162, %c0_163], %330 {strides = array<i32>} : memref<8x32xf32, #tpu.memory_space<vmem>>, vector<8x32xf32>,
    %c0_i32_164 = arith.constant 0 : i32
    %332 = arith.index_cast %c0_i32_164 : i32 to index
    %c0_165 = arith.constant 0 : index
    %c0_166 = arith.constant 0 : index
    %333 = vector.load %arg11[%332, %c0_165, %c0_166] : memref<8x8x128xf32, #tpu.memory_space<vmem>>, vector<1x8x128xf32>
    %334 = vector.shape_cast %333 : vector<1x8x128xf32> to vector<8x128xf32>
    %c0_167 = arith.constant 0 : index
    %c0_168 = arith.constant 0 : index
    %335 = vector.load %arg12[%c0_167, %c0_168] : memref<8x32xf32, #tpu.memory_space<vmem>>, vector<8x32xf32>
    %cst_169 = arith.constant dense<0.000000e+00> : vector<8x128xf32>
    %336 = tpu.matmul %335, %319, %cst_169 {dimension_numbers = #tpu.dot_dimension_numbers<[1], [0], [0], [1], [0, 0, 1, 1], [], []>} : vector<8x32xf32>, vector<32x128xf32>, vector<8x128xf32> -> vector<8x128xf32>
    %337 = arith.addf %334, %336 : vector<8x128xf32>
    %338 = vector.extract_strided_slice %337 {offsets = [0, 0], sizes = [8, 32], strides = [1, 1]} : vector<8x128xf32> to vector<8x32xf32>
    %339 = arith.negf %338 : vector<8x32xf32>
    %340 = math.exp %339 : vector<8x32xf32>
    %cst_170 = arith.constant 1.000000e+00 : f32
    %341 = vector.broadcast %cst_170 : f32 to vector<8x32xf32>
    %342 = arith.addf %341, %340 : vector<8x32xf32>
    %343 = arith.divf %341, %342 : vector<8x32xf32>
    %344 = vector.extract_strided_slice %337 {offsets = [0, 32], sizes = [8, 32], strides = [1, 1]} : vector<8x128xf32> to vector<8x32xf32>
    %345 = arith.negf %344 : vector<8x32xf32>
    %346 = math.exp %345 : vector<8x32xf32>
    %cst_171 = arith.constant 1.000000e+00 : f32
    %347 = vector.broadcast %cst_171 : f32 to vector<8x32xf32>
    %348 = arith.addf %347, %346 : vector<8x32xf32>
    %349 = arith.divf %347, %348 : vector<8x32xf32>
    %350 = vector.extract_strided_slice %337 {offsets = [0, 64], sizes = [8, 32], strides = [1, 1]} : vector<8x128xf32> to vector<8x32xf32>
    %351 = math.tanh %350 : vector<8x32xf32>
    %352 = vector.extract_strided_slice %337 {offsets = [0, 96], sizes = [8, 32], strides = [1, 1]} : vector<8x128xf32> to vector<8x32xf32>
    %353 = arith.negf %352 : vector<8x32xf32>
    %354 = math.exp %353 : vector<8x32xf32>
    %cst_172 = arith.constant 1.000000e+00 : f32
    %355 = vector.broadcast %cst_172 : f32 to vector<8x32xf32>
    %356 = arith.addf %355, %354 : vector<8x32xf32>
    %357 = arith.divf %355, %356 : vector<8x32xf32>
    %c0_173 = arith.constant 0 : index
    %c0_174 = arith.constant 0 : index
    %358 = vector.load %arg13[%c0_173, %c0_174] : memref<8x32xf32, #tpu.memory_space<vmem>>, vector<8x32xf32>
    %359 = arith.mulf %349, %358 : vector<8x32xf32>
    %360 = arith.mulf %343, %351 : vector<8x32xf32>
    %361 = arith.addf %359, %360 : vector<8x32xf32>
    %362 = math.tanh %361 : vector<8x32xf32>
    %363 = arith.mulf %357, %362 : vector<8x32xf32>
    %c0_175 = arith.constant 0 : index
    %c0_176 = arith.constant 0 : index
    %364 = vector.load %arg13[%c0_175, %c0_176] : memref<8x32xf32, #tpu.memory_space<vmem>>, vector<8x32xf32>
    tpu.vector_store %arg13[%c0_175, %c0_176], %361 {strides = array<i32>} : memref<8x32xf32, #tpu.memory_space<vmem>>, vector<8x32xf32>,
    %c0_177 = arith.constant 0 : index
    %c0_178 = arith.constant 0 : index
    %365 = vector.load %arg12[%c0_177, %c0_178] : memref<8x32xf32, #tpu.memory_space<vmem>>, vector<8x32xf32>
    tpu.vector_store %arg12[%c0_177, %c0_178], %363 {strides = array<i32>} : memref<8x32xf32, #tpu.memory_space<vmem>>, vector<8x32xf32>,
    %c1_i32_179 = arith.constant 1 : i32
    %366 = arith.index_cast %c1_i32_179 : i32 to index
    %c0_180 = arith.constant 0 : index
    %c0_181 = arith.constant 0 : index
    %367 = vector.load %arg11[%366, %c0_180, %c0_181] : memref<8x8x128xf32, #tpu.memory_space<vmem>>, vector<1x8x128xf32>
    %368 = vector.shape_cast %367 : vector<1x8x128xf32> to vector<8x128xf32>
    %c0_182 = arith.constant 0 : index
    %c0_183 = arith.constant 0 : index
    %369 = vector.load %arg12[%c0_182, %c0_183] : memref<8x32xf32, #tpu.memory_space<vmem>>, vector<8x32xf32>
    %cst_184 = arith.constant dense<0.000000e+00> : vector<8x128xf32>
    %370 = tpu.matmul %369, %319, %cst_184 {dimension_numbers = #tpu.dot_dimension_numbers<[1], [0], [0], [1], [0, 0, 1, 1], [], []>} : vector<8x32xf32>, vector<32x128xf32>, vector<8x128xf32> -> vector<8x128xf32>
    %371 = arith.addf %368, %370 : vector<8x128xf32>
    %372 = vector.extract_strided_slice %371 {offsets = [0, 0], sizes = [8, 32], strides = [1, 1]} : vector<8x128xf32> to vector<8x32xf32>
    %373 = arith.negf %372 : vector<8x32xf32>
    %374 = math.exp %373 : vector<8x32xf32>
    %cst_185 = arith.constant 1.000000e+00 : f32
    %375 = vector.broadcast %cst_185 : f32 to vector<8x32xf32>
    %376 = arith.addf %375, %374 : vector<8x32xf32>
    %377 = arith.divf %375, %376 : vector<8x32xf32>
    %378 = vector.extract_strided_slice %371 {offsets = [0, 32], sizes = [8, 32], strides = [1, 1]} : vector<8x128xf32> to vector<8x32xf32>
    %379 = arith.negf %378 : vector<8x32xf32>
    %380 = math.exp %379 : vector<8x32xf32>
    %cst_186 = arith.constant 1.000000e+00 : f32
    %381 = vector.broadcast %cst_186 : f32 to vector<8x32xf32>
    %382 = arith.addf %381, %380 : vector<8x32xf32>
    %383 = arith.divf %381, %382 : vector<8x32xf32>
    %384 = vector.extract_strided_slice %371 {offsets = [0, 64], sizes = [8, 32], strides = [1, 1]} : vector<8x128xf32> to vector<8x32xf32>
    %385 = math.tanh %384 : vector<8x32xf32>
    %386 = vector.extract_strided_slice %371 {offsets = [0, 96], sizes = [8, 32], strides = [1, 1]} : vector<8x128xf32> to vector<8x32xf32>
    %387 = arith.negf %386 : vector<8x32xf32>
    %388 = math.exp %387 : vector<8x32xf32>
    %cst_187 = arith.constant 1.000000e+00 : f32
    %389 = vector.broadcast %cst_187 : f32 to vector<8x32xf32>
    %390 = arith.addf %389, %388 : vector<8x32xf32>
    %391 = arith.divf %389, %390 : vector<8x32xf32>
    %c0_188 = arith.constant 0 : index
    %c0_189 = arith.constant 0 : index
    %392 = vector.load %arg13[%c0_188, %c0_189] : memref<8x32xf32, #tpu.memory_space<vmem>>, vector<8x32xf32>
    %393 = arith.mulf %383, %392 : vector<8x32xf32>
    %394 = arith.mulf %377, %385 : vector<8x32xf32>
    %395 = arith.addf %393, %394 : vector<8x32xf32>
    %396 = math.tanh %395 : vector<8x32xf32>
    %397 = arith.mulf %391, %396 : vector<8x32xf32>
    %c0_190 = arith.constant 0 : index
    %c0_191 = arith.constant 0 : index
    %398 = vector.load %arg13[%c0_190, %c0_191] : memref<8x32xf32, #tpu.memory_space<vmem>>, vector<8x32xf32>
    tpu.vector_store %arg13[%c0_190, %c0_191], %395 {strides = array<i32>} : memref<8x32xf32, #tpu.memory_space<vmem>>, vector<8x32xf32>,
    %c0_192 = arith.constant 0 : index
    %c0_193 = arith.constant 0 : index
    %399 = vector.load %arg12[%c0_192, %c0_193] : memref<8x32xf32, #tpu.memory_space<vmem>>, vector<8x32xf32>
    tpu.vector_store %arg12[%c0_192, %c0_193], %397 {strides = array<i32>} : memref<8x32xf32, #tpu.memory_space<vmem>>, vector<8x32xf32>,
    %c2_i32_194 = arith.constant 2 : i32
    %400 = arith.index_cast %c2_i32_194 : i32 to index
    %c0_195 = arith.constant 0 : index
    %c0_196 = arith.constant 0 : index
    %401 = vector.load %arg11[%400, %c0_195, %c0_196] : memref<8x8x128xf32, #tpu.memory_space<vmem>>, vector<1x8x128xf32>
    %402 = vector.shape_cast %401 : vector<1x8x128xf32> to vector<8x128xf32>
    %c0_197 = arith.constant 0 : index
    %c0_198 = arith.constant 0 : index
    %403 = vector.load %arg12[%c0_197, %c0_198] : memref<8x32xf32, #tpu.memory_space<vmem>>, vector<8x32xf32>
    %cst_199 = arith.constant dense<0.000000e+00> : vector<8x128xf32>
    %404 = tpu.matmul %403, %319, %cst_199 {dimension_numbers = #tpu.dot_dimension_numbers<[1], [0], [0], [1], [0, 0, 1, 1], [], []>} : vector<8x32xf32>, vector<32x128xf32>, vector<8x128xf32> -> vector<8x128xf32>
    %405 = arith.addf %402, %404 : vector<8x128xf32>
    %406 = vector.extract_strided_slice %405 {offsets = [0, 0], sizes = [8, 32], strides = [1, 1]} : vector<8x128xf32> to vector<8x32xf32>
    %407 = arith.negf %406 : vector<8x32xf32>
    %408 = math.exp %407 : vector<8x32xf32>
    %cst_200 = arith.constant 1.000000e+00 : f32
    %409 = vector.broadcast %cst_200 : f32 to vector<8x32xf32>
    %410 = arith.addf %409, %408 : vector<8x32xf32>
    %411 = arith.divf %409, %410 : vector<8x32xf32>
    %412 = vector.extract_strided_slice %405 {offsets = [0, 32], sizes = [8, 32], strides = [1, 1]} : vector<8x128xf32> to vector<8x32xf32>
    %413 = arith.negf %412 : vector<8x32xf32>
    %414 = math.exp %413 : vector<8x32xf32>
    %cst_201 = arith.constant 1.000000e+00 : f32
    %415 = vector.broadcast %cst_201 : f32 to vector<8x32xf32>
    %416 = arith.addf %415, %414 : vector<8x32xf32>
    %417 = arith.divf %415, %416 : vector<8x32xf32>
    %418 = vector.extract_strided_slice %405 {offsets = [0, 64], sizes = [8, 32], strides = [1, 1]} : vector<8x128xf32> to vector<8x32xf32>
    %419 = math.tanh %418 : vector<8x32xf32>
    %420 = vector.extract_strided_slice %405 {offsets = [0, 96], sizes = [8, 32], strides = [1, 1]} : vector<8x128xf32> to vector<8x32xf32>
    %421 = arith.negf %420 : vector<8x32xf32>
    %422 = math.exp %421 : vector<8x32xf32>
    %cst_202 = arith.constant 1.000000e+00 : f32
    %423 = vector.broadcast %cst_202 : f32 to vector<8x32xf32>
    %424 = arith.addf %423, %422 : vector<8x32xf32>
    %425 = arith.divf %423, %424 : vector<8x32xf32>
    %c0_203 = arith.constant 0 : index
    %c0_204 = arith.constant 0 : index
    %426 = vector.load %arg13[%c0_203, %c0_204] : memref<8x32xf32, #tpu.memory_space<vmem>>, vector<8x32xf32>
    %427 = arith.mulf %417, %426 : vector<8x32xf32>
    %428 = arith.mulf %411, %419 : vector<8x32xf32>
    %429 = arith.addf %427, %428 : vector<8x32xf32>
    %430 = math.tanh %429 : vector<8x32xf32>
    %431 = arith.mulf %425, %430 : vector<8x32xf32>
    %c0_205 = arith.constant 0 : index
    %c0_206 = arith.constant 0 : index
    %432 = vector.load %arg13[%c0_205, %c0_206] : memref<8x32xf32, #tpu.memory_space<vmem>>, vector<8x32xf32>
    tpu.vector_store %arg13[%c0_205, %c0_206], %429 {strides = array<i32>} : memref<8x32xf32, #tpu.memory_space<vmem>>, vector<8x32xf32>,
    %c0_207 = arith.constant 0 : index
    %c0_208 = arith.constant 0 : index
    %433 = vector.load %arg12[%c0_207, %c0_208] : memref<8x32xf32, #tpu.memory_space<vmem>>, vector<8x32xf32>
    tpu.vector_store %arg12[%c0_207, %c0_208], %431 {strides = array<i32>} : memref<8x32xf32, #tpu.memory_space<vmem>>, vector<8x32xf32>,
    %c3_i32_209 = arith.constant 3 : i32
    %434 = arith.index_cast %c3_i32_209 : i32 to index
    %c0_210 = arith.constant 0 : index
    %c0_211 = arith.constant 0 : index
    %435 = vector.load %arg11[%434, %c0_210, %c0_211] : memref<8x8x128xf32, #tpu.memory_space<vmem>>, vector<1x8x128xf32>
    %436 = vector.shape_cast %435 : vector<1x8x128xf32> to vector<8x128xf32>
    %c0_212 = arith.constant 0 : index
    %c0_213 = arith.constant 0 : index
    %437 = vector.load %arg12[%c0_212, %c0_213] : memref<8x32xf32, #tpu.memory_space<vmem>>, vector<8x32xf32>
    %cst_214 = arith.constant dense<0.000000e+00> : vector<8x128xf32>
    %438 = tpu.matmul %437, %319, %cst_214 {dimension_numbers = #tpu.dot_dimension_numbers<[1], [0], [0], [1], [0, 0, 1, 1], [], []>} : vector<8x32xf32>, vector<32x128xf32>, vector<8x128xf32> -> vector<8x128xf32>
    %439 = arith.addf %436, %438 : vector<8x128xf32>
    %440 = vector.extract_strided_slice %439 {offsets = [0, 0], sizes = [8, 32], strides = [1, 1]} : vector<8x128xf32> to vector<8x32xf32>
    %441 = arith.negf %440 : vector<8x32xf32>
    %442 = math.exp %441 : vector<8x32xf32>
    %cst_215 = arith.constant 1.000000e+00 : f32
    %443 = vector.broadcast %cst_215 : f32 to vector<8x32xf32>
    %444 = arith.addf %443, %442 : vector<8x32xf32>
    %445 = arith.divf %443, %444 : vector<8x32xf32>
    %446 = vector.extract_strided_slice %439 {offsets = [0, 32], sizes = [8, 32], strides = [1, 1]} : vector<8x128xf32> to vector<8x32xf32>
    %447 = arith.negf %446 : vector<8x32xf32>
    %448 = math.exp %447 : vector<8x32xf32>
    %cst_216 = arith.constant 1.000000e+00 : f32
    %449 = vector.broadcast %cst_216 : f32 to vector<8x32xf32>
    %450 = arith.addf %449, %448 : vector<8x32xf32>
    %451 = arith.divf %449, %450 : vector<8x32xf32>
    %452 = vector.extract_strided_slice %439 {offsets = [0, 64], sizes = [8, 32], strides = [1, 1]} : vector<8x128xf32> to vector<8x32xf32>
    %453 = math.tanh %452 : vector<8x32xf32>
    %454 = vector.extract_strided_slice %439 {offsets = [0, 96], sizes = [8, 32], strides = [1, 1]} : vector<8x128xf32> to vector<8x32xf32>
    %455 = arith.negf %454 : vector<8x32xf32>
    %456 = math.exp %455 : vector<8x32xf32>
    %cst_217 = arith.constant 1.000000e+00 : f32
    %457 = vector.broadcast %cst_217 : f32 to vector<8x32xf32>
    %458 = arith.addf %457, %456 : vector<8x32xf32>
    %459 = arith.divf %457, %458 : vector<8x32xf32>
    %c0_218 = arith.constant 0 : index
    %c0_219 = arith.constant 0 : index
    %460 = vector.load %arg13[%c0_218, %c0_219] : memref<8x32xf32, #tpu.memory_space<vmem>>, vector<8x32xf32>
    %461 = arith.mulf %451, %460 : vector<8x32xf32>
    %462 = arith.mulf %445, %453 : vector<8x32xf32>
    %463 = arith.addf %461, %462 : vector<8x32xf32>
    %464 = math.tanh %463 : vector<8x32xf32>
    %465 = arith.mulf %459, %464 : vector<8x32xf32>
    %c0_220 = arith.constant 0 : index
    %c0_221 = arith.constant 0 : index
    %466 = vector.load %arg13[%c0_220, %c0_221] : memref<8x32xf32, #tpu.memory_space<vmem>>, vector<8x32xf32>
    tpu.vector_store %arg13[%c0_220, %c0_221], %463 {strides = array<i32>} : memref<8x32xf32, #tpu.memory_space<vmem>>, vector<8x32xf32>,
    %c0_222 = arith.constant 0 : index
    %c0_223 = arith.constant 0 : index
    %467 = vector.load %arg12[%c0_222, %c0_223] : memref<8x32xf32, #tpu.memory_space<vmem>>, vector<8x32xf32>
    tpu.vector_store %arg12[%c0_222, %c0_223], %465 {strides = array<i32>} : memref<8x32xf32, #tpu.memory_space<vmem>>, vector<8x32xf32>,
    %c4_i32_224 = arith.constant 4 : i32
    %468 = arith.index_cast %c4_i32_224 : i32 to index
    %c0_225 = arith.constant 0 : index
    %c0_226 = arith.constant 0 : index
    %469 = vector.load %arg11[%468, %c0_225, %c0_226] : memref<8x8x128xf32, #tpu.memory_space<vmem>>, vector<1x8x128xf32>
    %470 = vector.shape_cast %469 : vector<1x8x128xf32> to vector<8x128xf32>
    %c0_227 = arith.constant 0 : index
    %c0_228 = arith.constant 0 : index
    %471 = vector.load %arg12[%c0_227, %c0_228] : memref<8x32xf32, #tpu.memory_space<vmem>>, vector<8x32xf32>
    %cst_229 = arith.constant dense<0.000000e+00> : vector<8x128xf32>
    %472 = tpu.matmul %471, %319, %cst_229 {dimension_numbers = #tpu.dot_dimension_numbers<[1], [0], [0], [1], [0, 0, 1, 1], [], []>} : vector<8x32xf32>, vector<32x128xf32>, vector<8x128xf32> -> vector<8x128xf32>
    %473 = arith.addf %470, %472 : vector<8x128xf32>
    %474 = vector.extract_strided_slice %473 {offsets = [0, 0], sizes = [8, 32], strides = [1, 1]} : vector<8x128xf32> to vector<8x32xf32>
    %475 = arith.negf %474 : vector<8x32xf32>
    %476 = math.exp %475 : vector<8x32xf32>
    %cst_230 = arith.constant 1.000000e+00 : f32
    %477 = vector.broadcast %cst_230 : f32 to vector<8x32xf32>
    %478 = arith.addf %477, %476 : vector<8x32xf32>
    %479 = arith.divf %477, %478 : vector<8x32xf32>
    %480 = vector.extract_strided_slice %473 {offsets = [0, 32], sizes = [8, 32], strides = [1, 1]} : vector<8x128xf32> to vector<8x32xf32>
    %481 = arith.negf %480 : vector<8x32xf32>
    %482 = math.exp %481 : vector<8x32xf32>
    %cst_231 = arith.constant 1.000000e+00 : f32
    %483 = vector.broadcast %cst_231 : f32 to vector<8x32xf32>
    %484 = arith.addf %483, %482 : vector<8x32xf32>
    %485 = arith.divf %483, %484 : vector<8x32xf32>
    %486 = vector.extract_strided_slice %473 {offsets = [0, 64], sizes = [8, 32], strides = [1, 1]} : vector<8x128xf32> to vector<8x32xf32>
    %487 = math.tanh %486 : vector<8x32xf32>
    %488 = vector.extract_strided_slice %473 {offsets = [0, 96], sizes = [8, 32], strides = [1, 1]} : vector<8x128xf32> to vector<8x32xf32>
    %489 = arith.negf %488 : vector<8x32xf32>
    %490 = math.exp %489 : vector<8x32xf32>
    %cst_232 = arith.constant 1.000000e+00 : f32
    %491 = vector.broadcast %cst_232 : f32 to vector<8x32xf32>
    %492 = arith.addf %491, %490 : vector<8x32xf32>
    %493 = arith.divf %491, %492 : vector<8x32xf32>
    %c0_233 = arith.constant 0 : index
    %c0_234 = arith.constant 0 : index
    %494 = vector.load %arg13[%c0_233, %c0_234] : memref<8x32xf32, #tpu.memory_space<vmem>>, vector<8x32xf32>
    %495 = arith.mulf %485, %494 : vector<8x32xf32>
    %496 = arith.mulf %479, %487 : vector<8x32xf32>
    %497 = arith.addf %495, %496 : vector<8x32xf32>
    %498 = math.tanh %497 : vector<8x32xf32>
    %499 = arith.mulf %493, %498 : vector<8x32xf32>
    %c0_235 = arith.constant 0 : index
    %c0_236 = arith.constant 0 : index
    %500 = vector.load %arg13[%c0_235, %c0_236] : memref<8x32xf32, #tpu.memory_space<vmem>>, vector<8x32xf32>
    tpu.vector_store %arg13[%c0_235, %c0_236], %497 {strides = array<i32>} : memref<8x32xf32, #tpu.memory_space<vmem>>, vector<8x32xf32>,
    %c0_237 = arith.constant 0 : index
    %c0_238 = arith.constant 0 : index
    %501 = vector.load %arg12[%c0_237, %c0_238] : memref<8x32xf32, #tpu.memory_space<vmem>>, vector<8x32xf32>
    tpu.vector_store %arg12[%c0_237, %c0_238], %499 {strides = array<i32>} : memref<8x32xf32, #tpu.memory_space<vmem>>, vector<8x32xf32>,
    %c5_i32_239 = arith.constant 5 : i32
    %502 = arith.index_cast %c5_i32_239 : i32 to index
    %c0_240 = arith.constant 0 : index
    %c0_241 = arith.constant 0 : index
    %503 = vector.load %arg11[%502, %c0_240, %c0_241] : memref<8x8x128xf32, #tpu.memory_space<vmem>>, vector<1x8x128xf32>
    %504 = vector.shape_cast %503 : vector<1x8x128xf32> to vector<8x128xf32>
    %c0_242 = arith.constant 0 : index
    %c0_243 = arith.constant 0 : index
    %505 = vector.load %arg12[%c0_242, %c0_243] : memref<8x32xf32, #tpu.memory_space<vmem>>, vector<8x32xf32>
    %cst_244 = arith.constant dense<0.000000e+00> : vector<8x128xf32>
    %506 = tpu.matmul %505, %319, %cst_244 {dimension_numbers = #tpu.dot_dimension_numbers<[1], [0], [0], [1], [0, 0, 1, 1], [], []>} : vector<8x32xf32>, vector<32x128xf32>, vector<8x128xf32> -> vector<8x128xf32>
    %507 = arith.addf %504, %506 : vector<8x128xf32>
    %508 = vector.extract_strided_slice %507 {offsets = [0, 0], sizes = [8, 32], strides = [1, 1]} : vector<8x128xf32> to vector<8x32xf32>
    %509 = arith.negf %508 : vector<8x32xf32>
    %510 = math.exp %509 : vector<8x32xf32>
    %cst_245 = arith.constant 1.000000e+00 : f32
    %511 = vector.broadcast %cst_245 : f32 to vector<8x32xf32>
    %512 = arith.addf %511, %510 : vector<8x32xf32>
    %513 = arith.divf %511, %512 : vector<8x32xf32>
    %514 = vector.extract_strided_slice %507 {offsets = [0, 32], sizes = [8, 32], strides = [1, 1]} : vector<8x128xf32> to vector<8x32xf32>
    %515 = arith.negf %514 : vector<8x32xf32>
    %516 = math.exp %515 : vector<8x32xf32>
    %cst_246 = arith.constant 1.000000e+00 : f32
    %517 = vector.broadcast %cst_246 : f32 to vector<8x32xf32>
    %518 = arith.addf %517, %516 : vector<8x32xf32>
    %519 = arith.divf %517, %518 : vector<8x32xf32>
    %520 = vector.extract_strided_slice %507 {offsets = [0, 64], sizes = [8, 32], strides = [1, 1]} : vector<8x128xf32> to vector<8x32xf32>
    %521 = math.tanh %520 : vector<8x32xf32>
    %522 = vector.extract_strided_slice %507 {offsets = [0, 96], sizes = [8, 32], strides = [1, 1]} : vector<8x128xf32> to vector<8x32xf32>
    %523 = arith.negf %522 : vector<8x32xf32>
    %524 = math.exp %523 : vector<8x32xf32>
    %cst_247 = arith.constant 1.000000e+00 : f32
    %525 = vector.broadcast %cst_247 : f32 to vector<8x32xf32>
    %526 = arith.addf %525, %524 : vector<8x32xf32>
    %527 = arith.divf %525, %526 : vector<8x32xf32>
    %c0_248 = arith.constant 0 : index
    %c0_249 = arith.constant 0 : index
    %528 = vector.load %arg13[%c0_248, %c0_249] : memref<8x32xf32, #tpu.memory_space<vmem>>, vector<8x32xf32>
    %529 = arith.mulf %519, %528 : vector<8x32xf32>
    %530 = arith.mulf %513, %521 : vector<8x32xf32>
    %531 = arith.addf %529, %530 : vector<8x32xf32>
    %532 = math.tanh %531 : vector<8x32xf32>
    %533 = arith.mulf %527, %532 : vector<8x32xf32>
    %c0_250 = arith.constant 0 : index
    %c0_251 = arith.constant 0 : index
    %534 = vector.load %arg13[%c0_250, %c0_251] : memref<8x32xf32, #tpu.memory_space<vmem>>, vector<8x32xf32>
    tpu.vector_store %arg13[%c0_250, %c0_251], %531 {strides = array<i32>} : memref<8x32xf32, #tpu.memory_space<vmem>>, vector<8x32xf32>,
    %c0_252 = arith.constant 0 : index
    %c0_253 = arith.constant 0 : index
    %535 = vector.load %arg12[%c0_252, %c0_253] : memref<8x32xf32, #tpu.memory_space<vmem>>, vector<8x32xf32>
    tpu.vector_store %arg12[%c0_252, %c0_253], %533 {strides = array<i32>} : memref<8x32xf32, #tpu.memory_space<vmem>>, vector<8x32xf32>,
    %c6_i32_254 = arith.constant 6 : i32
    %536 = arith.index_cast %c6_i32_254 : i32 to index
    %c0_255 = arith.constant 0 : index
    %c0_256 = arith.constant 0 : index
    %537 = vector.load %arg11[%536, %c0_255, %c0_256] : memref<8x8x128xf32, #tpu.memory_space<vmem>>, vector<1x8x128xf32>
    %538 = vector.shape_cast %537 : vector<1x8x128xf32> to vector<8x128xf32>
    %c0_257 = arith.constant 0 : index
    %c0_258 = arith.constant 0 : index
    %539 = vector.load %arg12[%c0_257, %c0_258] : memref<8x32xf32, #tpu.memory_space<vmem>>, vector<8x32xf32>
    %cst_259 = arith.constant dense<0.000000e+00> : vector<8x128xf32>
    %540 = tpu.matmul %539, %319, %cst_259 {dimension_numbers = #tpu.dot_dimension_numbers<[1], [0], [0], [1], [0, 0, 1, 1], [], []>} : vector<8x32xf32>, vector<32x128xf32>, vector<8x128xf32> -> vector<8x128xf32>
    %541 = arith.addf %538, %540 : vector<8x128xf32>
    %542 = vector.extract_strided_slice %541 {offsets = [0, 0], sizes = [8, 32], strides = [1, 1]} : vector<8x128xf32> to vector<8x32xf32>
    %543 = arith.negf %542 : vector<8x32xf32>
    %544 = math.exp %543 : vector<8x32xf32>
    %cst_260 = arith.constant 1.000000e+00 : f32
    %545 = vector.broadcast %cst_260 : f32 to vector<8x32xf32>
    %546 = arith.addf %545, %544 : vector<8x32xf32>
    %547 = arith.divf %545, %546 : vector<8x32xf32>
    %548 = vector.extract_strided_slice %541 {offsets = [0, 32], sizes = [8, 32], strides = [1, 1]} : vector<8x128xf32> to vector<8x32xf32>
    %549 = arith.negf %548 : vector<8x32xf32>
    %550 = math.exp %549 : vector<8x32xf32>
    %cst_261 = arith.constant 1.000000e+00 : f32
    %551 = vector.broadcast %cst_261 : f32 to vector<8x32xf32>
    %552 = arith.addf %551, %550 : vector<8x32xf32>
    %553 = arith.divf %551, %552 : vector<8x32xf32>
    %554 = vector.extract_strided_slice %541 {offsets = [0, 64], sizes = [8, 32], strides = [1, 1]} : vector<8x128xf32> to vector<8x32xf32>
    %555 = math.tanh %554 : vector<8x32xf32>
    %556 = vector.extract_strided_slice %541 {offsets = [0, 96], sizes = [8, 32], strides = [1, 1]} : vector<8x128xf32> to vector<8x32xf32>
    %557 = arith.negf %556 : vector<8x32xf32>
    %558 = math.exp %557 : vector<8x32xf32>
    %cst_262 = arith.constant 1.000000e+00 : f32
    %559 = vector.broadcast %cst_262 : f32 to vector<8x32xf32>
    %560 = arith.addf %559, %558 : vector<8x32xf32>
    %561 = arith.divf %559, %560 : vector<8x32xf32>
    %c0_263 = arith.constant 0 : index
    %c0_264 = arith.constant 0 : index
    %562 = vector.load %arg13[%c0_263, %c0_264] : memref<8x32xf32, #tpu.memory_space<vmem>>, vector<8x32xf32>
    %563 = arith.mulf %553, %562 : vector<8x32xf32>
    %564 = arith.mulf %547, %555 : vector<8x32xf32>
    %565 = arith.addf %563, %564 : vector<8x32xf32>
    %566 = math.tanh %565 : vector<8x32xf32>
    %567 = arith.mulf %561, %566 : vector<8x32xf32>
    %c0_265 = arith.constant 0 : index
    %c0_266 = arith.constant 0 : index
    %568 = vector.load %arg13[%c0_265, %c0_266] : memref<8x32xf32, #tpu.memory_space<vmem>>, vector<8x32xf32>
    tpu.vector_store %arg13[%c0_265, %c0_266], %565 {strides = array<i32>} : memref<8x32xf32, #tpu.memory_space<vmem>>, vector<8x32xf32>,
    %c0_267 = arith.constant 0 : index
    %c0_268 = arith.constant 0 : index
    %569 = vector.load %arg12[%c0_267, %c0_268] : memref<8x32xf32, #tpu.memory_space<vmem>>, vector<8x32xf32>
    tpu.vector_store %arg12[%c0_267, %c0_268], %567 {strides = array<i32>} : memref<8x32xf32, #tpu.memory_space<vmem>>, vector<8x32xf32>,
    %c7_i32_269 = arith.constant 7 : i32
    %570 = arith.index_cast %c7_i32_269 : i32 to index
    %c0_270 = arith.constant 0 : index
    %c0_271 = arith.constant 0 : index
    %571 = vector.load %arg11[%570, %c0_270, %c0_271] : memref<8x8x128xf32, #tpu.memory_space<vmem>>, vector<1x8x128xf32>
    %572 = vector.shape_cast %571 : vector<1x8x128xf32> to vector<8x128xf32>
    %c0_272 = arith.constant 0 : index
    %c0_273 = arith.constant 0 : index
    %573 = vector.load %arg12[%c0_272, %c0_273] : memref<8x32xf32, #tpu.memory_space<vmem>>, vector<8x32xf32>
    %cst_274 = arith.constant dense<0.000000e+00> : vector<8x128xf32>
    %574 = tpu.matmul %573, %319, %cst_274 {dimension_numbers = #tpu.dot_dimension_numbers<[1], [0], [0], [1], [0, 0, 1, 1], [], []>} : vector<8x32xf32>, vector<32x128xf32>, vector<8x128xf32> -> vector<8x128xf32>
    %575 = arith.addf %572, %574 : vector<8x128xf32>
    %576 = vector.extract_strided_slice %575 {offsets = [0, 0], sizes = [8, 32], strides = [1, 1]} : vector<8x128xf32> to vector<8x32xf32>
    %577 = arith.negf %576 : vector<8x32xf32>
    %578 = math.exp %577 : vector<8x32xf32>
    %cst_275 = arith.constant 1.000000e+00 : f32
    %579 = vector.broadcast %cst_275 : f32 to vector<8x32xf32>
    %580 = arith.addf %579, %578 : vector<8x32xf32>
    %581 = arith.divf %579, %580 : vector<8x32xf32>
    %582 = vector.extract_strided_slice %575 {offsets = [0, 32], sizes = [8, 32], strides = [1, 1]} : vector<8x128xf32> to vector<8x32xf32>
    %583 = arith.negf %582 : vector<8x32xf32>
    %584 = math.exp %583 : vector<8x32xf32>
    %cst_276 = arith.constant 1.000000e+00 : f32
    %585 = vector.broadcast %cst_276 : f32 to vector<8x32xf32>
    %586 = arith.addf %585, %584 : vector<8x32xf32>
    %587 = arith.divf %585, %586 : vector<8x32xf32>
    %588 = vector.extract_strided_slice %575 {offsets = [0, 64], sizes = [8, 32], strides = [1, 1]} : vector<8x128xf32> to vector<8x32xf32>
    %589 = math.tanh %588 : vector<8x32xf32>
    %590 = vector.extract_strided_slice %575 {offsets = [0, 96], sizes = [8, 32], strides = [1, 1]} : vector<8x128xf32> to vector<8x32xf32>
    %591 = arith.negf %590 : vector<8x32xf32>
    %592 = math.exp %591 : vector<8x32xf32>
    %cst_277 = arith.constant 1.000000e+00 : f32
    %593 = vector.broadcast %cst_277 : f32 to vector<8x32xf32>
    %594 = arith.addf %593, %592 : vector<8x32xf32>
    %595 = arith.divf %593, %594 : vector<8x32xf32>
    %c0_278 = arith.constant 0 : index
    %c0_279 = arith.constant 0 : index
    %596 = vector.load %arg13[%c0_278, %c0_279] : memref<8x32xf32, #tpu.memory_space<vmem>>, vector<8x32xf32>
    %597 = arith.mulf %587, %596 : vector<8x32xf32>
    %598 = arith.mulf %581, %589 : vector<8x32xf32>
    %599 = arith.addf %597, %598 : vector<8x32xf32>
    %600 = math.tanh %599 : vector<8x32xf32>
    %601 = arith.mulf %595, %600 : vector<8x32xf32>
    %c0_280 = arith.constant 0 : index
    %c0_281 = arith.constant 0 : index
    %602 = vector.load %arg13[%c0_280, %c0_281] : memref<8x32xf32, #tpu.memory_space<vmem>>, vector<8x32xf32>
    tpu.vector_store %arg13[%c0_280, %c0_281], %599 {strides = array<i32>} : memref<8x32xf32, #tpu.memory_space<vmem>>, vector<8x32xf32>,
    %c0_282 = arith.constant 0 : index
    %c0_283 = arith.constant 0 : index
    %603 = vector.load %arg12[%c0_282, %c0_283] : memref<8x32xf32, #tpu.memory_space<vmem>>, vector<8x32xf32>
    tpu.vector_store %arg12[%c0_282, %c0_283], %601 {strides = array<i32>} : memref<8x32xf32, #tpu.memory_space<vmem>>, vector<8x32xf32>,
    %c8_i32_284 = arith.constant 8 : i32
    %c0_285 = arith.constant 0 : index
    %c0_286 = arith.constant 0 : index
    %604 = vector.load %arg12[%c0_285, %c0_286] : memref<8x32xf32, #tpu.memory_space<vmem>>, vector<8x32xf32>
    %c0_287 = arith.constant 0 : index
    %c0_288 = arith.constant 0 : index
    %605 = vector.load %arg7[%c0_287, %c0_288] : memref<1x32xf32, #tpu.memory_space<vmem>>, vector<1x32xf32>
    %606 = vector.broadcast %605 : vector<1x32xf32> to vector<8x32xf32>
    %607 = arith.mulf %604, %606 : vector<8x32xf32>
    %cst_289 = arith.constant dense<0.000000e+00> : vector<8xf32>
    %608 = vector.multi_reduction <add>, %607, %cst_289 [1] : vector<8x32xf32> to vector<8xf32>
    %609 = vector.shape_cast %608 : vector<8xf32> to vector<8x1xf32>
    %c0_290 = arith.constant 0 : index
    %c0_291 = arith.constant 0 : index
    %610 = vector.load %arg8[%c0_290, %c0_291] : memref<1x1xf32, #tpu.memory_space<vmem>>, vector<1x1xf32>
    %611 = vector.broadcast %610 : vector<1x1xf32> to vector<8x1xf32>
    %612 = arith.addf %609, %611 : vector<8x1xf32>
    %c0_292 = arith.constant 0 : index
    %c0_293 = arith.constant 0 : index
    %613 = vector.load %arg9[%c0_292, %c0_293] : memref<8x1xf32, #tpu.memory_space<vmem>>, vector<8x1xf32>
    tpu.vector_store %arg9[%c0_292, %c0_293], %612 {strides = array<i32>} : memref<8x1xf32, #tpu.memory_space<vmem>>, vector<8x1xf32>,
    return
  }
}

</mosaic_0001>

<bundles_post_ra>
// kernel: tpu_custom_call.1
= control target key start
LH: loop header
LB: loop body
LE: loop exit
PB: predicated region body
PF: predicated region fallthrough
CT: control target
= control target key end

     0   :  { %vm79_vm0 = vcmask 1043456   ;;  %vm54_vm1 = vcmask 31744   ;;  %v2851_v0 = vmov 0.0|0.0   ;;  %vm196_vm2 = vcmask 261120   ;;  %s2854_s23 = smov 64   ;;  %s2855_s24 = smov 32   ;;  %s3324_s2 = inlined_call_operand.vmem [shape: f32[32,128], index: 2, kind: input, shape index: {}]   ;;  %s3325_s1 = inlined_call_operand.vmem [shape: f32[4,128], index: 1, kind: input, shape index: {}]   ;;  %s3326_s0 = inlined_call_operand.vmem [shape: f32[8,8,4], index: 0, kind: input, shape index: {}]   ;;  %s3327_s3 = inlined_call_operand.vmem [shape: f32[1,128], index: 3, kind: input, shape index: {}]   ;;  %s3328_s4 = inlined_call_operand.vmem [shape: f32[32,128], index: 4, kind: input, shape index: {}]   ;;  %s3329_s5 = inlined_call_operand.vmem [shape: f32[32,128], index: 5, kind: input, shape index: {}]   ;;  %s3330_s6 = inlined_call_operand.vmem [shape: f32[1,128], index: 6, kind: input, shape index: {}]   ;;  %s3331_s8 = inlined_call_operand.<no memory space> [shape: f32[1,1], index: 8, kind: input, shape index: {}]   ;;  %s3332_s7 = inlined_call_operand.vmem [shape: f32[1,32], index: 7, kind: input, shape index: {}]   ;;  %s3333_s9 = inlined_call_operand.vmem [shape: f32[8,1], index: 9, kind: output, shape index: {}]  }
   0x1   :  { %2613 = vmatprep.subr.bf16.mxu1 %v2851_v0  ;;  %v35_v1 = vld [vmem:[%s3324_s2] sm:$0xff]  ;;  %v36_v2 = vld [vmem:[%s3324_s2 + $0x8] sm:$0xff]  ;;  %v37_v7 = vld [vmem:[%s3324_s2 + $0x10] sm:$0xff]  ;;  %vm2852_vm3 = vmmov 0   ;;  %v2853_v8 = vmov 0.0   ;;  %vm2243_vm4 = vcmask 7168  }
   0x2   :  { %v34_v3 = vld [vmem:[%s3325_s1] sm:$0xf]  ;;  %v2917_v4 = vpack.c.bf16 %v36_v2, %v35_v1  ;;  %v41_v6 = vld [vmem:[%s3326_s0 + $0x8] sm:$0xff]  ;;  %2425 = vmatprep.mubr.msk.f32.mxu1 %vm2852_vm3, %v2853_v8  ;;  %197 = vst.msk [vmem:[#allocation4] sm:$0xff] %vm196_vm2, %v2853_v8  ;;  %198 = vst.msk [vmem:[#allocation5] sm:$0xff] %vm196_vm2, %v2853_v8 }
   0x3   :  { %2403 = vmatprep.subr.msk.mxu0 %vm79_vm0, %v34_v3  ;;  %v40_v5 = vld [vmem:[%s3326_s0] sm:$0xff]  ;;  %v38_v9 = vld [vmem:[%s3324_s2 + $0x18] sm:$0xff]  ;;  %v42_v54 = vld [vmem:[%s3326_s0 + $0x10] sm:$0xff] }
   0x4   :  { %2404 = vmatpush3.msk.msra.mxu0 %vm79_vm0, %v34_v3  ;;  %2405 = vmatprep.mubr.msk.f32.mxu0 %vm54_vm1, %v40_v5  ;;  %v2942_v10 = vpack.c.bf16 %v38_v9, %v37_v7  ;;  %v2962_v13 = vld [vmem:[%s3327_s3] ss:$0 sm:$0xff]  ;;  %s2856_s3 = smov 96   ;;  %v43_v55 = vld [vmem:[%s3326_s0 + $0x18] sm:$0xff]  ;;  %v45_v57 = vld [vmem:[%s3326_s0 + $0x28] sm:$0xff] }
   0x5   :  { %2615 = vmatpush3.bf16.msra.mxu1 %v2917_v4  ;;  %2406 = vmatmul.mubr.msk.f32.vlgmr.msra.gmra.mrb[0].mxu0 %vm54_vm1, %v41_v6  ;;  %v44_v56 = vld [vmem:[%s3326_s0 + $0x20] sm:$0xff]  ;;  %v46_v58 = vld [vmem:[%s3326_s0 + $0x30] sm:$0xff]  ;;  %v47_v59 = vld [vmem:[%s3326_s0 + $0x38] sm:$0xff] }
   0x6   :  { %2616 = vmatprep.subr.bf16.mxu1 %v2851_v0  ;;  %2625 = vmatprep.subr.bf16.mxu0 %v2851_v0 }
   0x7   :  { %2627 = vmatpush3.bf16.msra.mxu0 %v2917_v4  ;;  %2408 = vmatprep.mubr.msk.f32.mxu0 %vm54_vm1, %v42_v54 }
   0x8   :  { %2628 = vmatprep.subr.bf16.mxu0 %v2851_v0 }
   0x9   :  { %2618 = vmatpush3.bf16.msra.mxu1 %v2942_v10  ;;  %v200_v11 = vld [vmem:[#allocation4] sm:$0xff]  ;;  %v282_v20 = vld [vmem:[#allocation5] sm:$0xff]  ;;  %2409 = vmatmul.mubr.msk.f32.gmra.mrb[2].mxu0 %vm54_vm1, %v43_v55 }
   0xa   :  { %2619 = vmatprep.subr.bf16.mxu1 %v2851_v0  ;;  %2411 = vmatprep.mubr.msk.f32.mxu0 %vm54_vm1, %v44_v56 }
   0xb   :  { %2630 = vmatpush3.bf16.msra.mxu0 %v2942_v10 }
   0xc   :  { %2426 = vmatmul.mubr.msk.f32.vlgmr.msra.gmra.mrb[0].mxu1 %vm196_vm2, %v200_v11  ;;  %2637 = vmatprep.subr.bf16.mxu0 %v2851_v0 }
   0xd   :  { %2621 = vmatpush3.bf16.msra.mxu1 %v2917_v4  ;;  %2436 = vmatprep.mubr.msk.f32.mxu1 %vm2852_vm3, %v2853_v8 }
   0xe   :  { %2622 = vmatprep.subr.bf16.mxu1 %v2851_v0  ;;  %2412 = vmatmul.mubr.msk.f32.gmra.mrb[4].mxu0 %vm54_vm1, %v45_v57 }
   0xf   :  { %2414 = vmatprep.mubr.msk.f32.mxu0 %vm54_vm1, %v46_v58 }
  0x11   :  { %2624 = vmatpush3.bf16.msra.mxu1 %v2942_v10 }
  0x12   :  { %2631 = vmatprep.subr.bf16.mxu1 %v2851_v0  ;;  %2415 = vmatmul.mubr.msk.f32.gmra.mrb[6].mxu0 %vm54_vm1, %v47_v59 }
  0x13   :  { %2447 = vmatprep.mubr.msk.f32.mxu0 %vm2852_vm3, %v2853_v8 }
  0xd8   :  { %v2407_v12 = vpop.f32.mrb[0].mxu0 }
  0xd9   :  { %v149_v14 = vpop.f32.mrb[1].mxu0  ;;  %v155_v38 = vadd.f32 %v2407_v12, %v2962_v13 }
  0xda   :  { %v150_v15 = vadd.f32 %v2962_v13, %v149_v14 }
  0xdc   :  { %v2410_v1 = vpop.f32.mrb[2].mxu0 }
  0xdd   :  { %v159_v2 = vpop.f32.mrb[3].mxu0 }
  0xde   :  { %v160_v12 = vadd.f32 %v2962_v13, %v159_v2 }
  0xdf   :  { %v270_v16 = vpop.f32.mrb[0].mxu1 }
  0xe0   :  { %v274_v17 = vadd.f32 %v270_v16, %v150_v15  ;;  %v2427_v18 = vpop.f32.mrb[1].mxu1 }
  0xe1   :  { %v3016_v3 = vpop.f32.mrb[4].mxu0 }
  0xe2   :  { %2723 = vtanh.f32 %v274_v17  ;;  %v2260_v21 = vmul.f32 -1.442695, %v274_v17  ;;  %v3018_v5 = vpop.f32.mrb[5].mxu0 }
  0xe3   :  { %v170_v57 = vadd.f32 %v2962_v13, %v3018_v5 }
  0xe4   :  { %2725 = vpow2.f32 %v2260_v21 }
  0xe5   :  { %v3029_v9 = vpop.f32.mrb[6].mxu0 }
  0xe6   :  { %v3031_v11 = vpop.f32.mrb[7].mxu0 }
  0xec   :  { %v2724_v19 = vpop.eup %2723 }
  0xed   :  { %289 = vrot.lane.b32.xlu0 %v2724_v19, %s2854_s23 }
  0xee   :  { %v2726_v22 = vpop.eup %2725 }
  0xef   :  { %v278_v23 = vadd.f32 1.0, %v2726_v22 }
  0xf1   :  { %284 = vrot.lane.b32.xlu0 %v282_v20, %s2855_s24  ;;  %2727 = vrcp.f32 %v278_v23 }
  0xfb   :  { %v2728_v24 = vpop.eup %2727 }
 0x15f   :  { %v290_v25 = vpop.permute.xlu0 %289 }
 0x160   :  { %v292_v26 = vmul.f32 %v2728_v24, %v290_v25 }
 0x162   :  { %294 = vrot.lane.b32.xlu1 %v292_v26, %s2855_s24 }
 0x163   :  { %v285_v27 = vpop.permute.xlu0 %284 }
 0x164   :  { %v287_v28 = vmul.f32 %v2728_v24, %v285_v27 }
 0x1d4   :  { %v295_v29 = vpop.permute.xlu1 %294 }
 0x1d5   :  { %v297_v30 = vadd.f32 %v295_v29, %v287_v28 }
 0x1d7   :  { %2729 = vtanh.f32 %v297_v30 }
 0x1e1   :  { %v2730_v31 = vpop.eup %2729 }
 0x1e2   :  { %300 = vrot.lane.b32.xlu1 %v2730_v31, %s2854_s23 }
 0x1e6   :  { %305 = vrot.lane.b32.xlu1 %v297_v30, %s2856_s3 }
 0x254   :  { %v301_v32 = vpop.permute.xlu1 %300 }
 0x255   :  { %v303_v33 = vmul.f32 %v2728_v24, %v301_v32 }
 0x257   :  { %310 = vrot.lane.b32.xlu0 %v303_v33, %s2855_s24 }
 0x258   :  { %v306_v34 = vpop.permute.xlu1 %305 }
 0x259   :  { %308 = vst.msk [vmem:[#allocation5] sm:$0xff] %vm196_vm2, %v306_v34 }
 0x260   :  { %v399_v35 = vld [vmem:[#allocation5] sm:$0xff] }
 0x261   :  { %401 = vrot.lane.b32.xlu1 %v399_v35, %s2855_s24  ;;  %v165_v35 = vadd.f32 %v2410_v1, %v2962_v13 }
 0x2c9   :  { %v311_v36 = vpop.permute.xlu0 %310 }
 0x2ca   :  { %313 = vst.msk [vmem:[#allocation4] sm:$0xff] %vm196_vm2, %v311_v36  ;;  %314 = vst.msk [vmem:[#allocation2] sm:$0xff] %vm196_vm2, %v311_v36 }
 0x2d1   :  { %v317_v37 = vld [vmem:[#allocation4] sm:$0xff] }
 0x2d2   :  { %2437 = vmatmul.mubr.msk.f32.vlgmr.msra.gmra.mrb[2].mxu1 %vm196_vm2, %v317_v37 }
 0x2d3   :  { %2633 = vmatpush3.bf16.msra.mxu1 %v2917_v4  ;;  %2458 = vmatprep.mubr.msk.f32.mxu1 %vm2852_vm3, %v2853_v8  ;;  %v402_v49 = vpop.permute.xlu1 %401 }
 0x2d4   :  { %2634 = vmatprep.subr.bf16.mxu1 %v2851_v0 }
 0x2d7   :  { %2636 = vmatpush3.bf16.msra.mxu1 %v2942_v10 }
 0x2d8   :  { %2643 = vmatprep.subr.bf16.mxu1 %v2851_v0 }
 0x3a5   :  { %v387_v39 = vpop.f32.mrb[2].mxu1 }
 0x3a6   :  { %v391_v40 = vadd.f32 %v387_v39, %v155_v38  ;;  %v2438_v41 = vpop.f32.mrb[3].mxu1 }
 0x3a8   :  { %2731 = vtanh.f32 %v391_v40  ;;  %v2262_v43 = vmul.f32 -1.442695, %v391_v40 }
 0x3aa   :  { %2733 = vpow2.f32 %v2262_v43 }
 0x3b2   :  { %v2732_v42 = vpop.eup %2731 }
 0x3b3   :  { %406 = vrot.lane.b32.xlu0 %v2732_v42, %s2854_s23 }
 0x3b4   :  { %v2734_v44 = vpop.eup %2733 }
 0x3b5   :  { %v395_v45 = vadd.f32 1.0, %v2734_v44 }
 0x3b7   :  { %2735 = vrcp.f32 %v395_v45 }
 0x3c1   :  { %v2736_v46 = vpop.eup %2735 }
 0x3c2   :  { %v404_v50 = vmul.f32 %v2736_v46, %v402_v49 }
 0x425   :  { %v407_v47 = vpop.permute.xlu0 %406 }
 0x426   :  { %v409_v48 = vmul.f32 %v2736_v46, %v407_v47 }
 0x428   :  { %411 = vrot.lane.b32.xlu0 %v409_v48, %s2855_s24 }
 0x49a   :  { %v412_v51 = vpop.permute.xlu0 %411 }
 0x49b   :  { %v414_v52 = vadd.f32 %v412_v51, %v404_v50 }
 0x49d   :  { %2737 = vtanh.f32 %v414_v52 }
 0x4a7   :  { %v2738_v53 = vpop.eup %2737 }
 0x4a8   :  { %417 = vrot.lane.b32.xlu1 %v2738_v53, %s2854_s23 }
 0x4ac   :  { %422 = vrot.lane.b32.xlu1 %v414_v52, %s2856_s3 }
 0x51a   :  { %v418_v60 = vpop.permute.xlu1 %417 }
 0x51b   :  { %v420_v61 = vmul.f32 %v2736_v46, %v418_v60 }
 0x51d   :  { %427 = vrot.lane.b32.xlu0 %v420_v61, %s2855_s24 }
 0x51e   :  { %v423_v62 = vpop.permute.xlu1 %422 }
 0x51f   :  { %425 = vst.msk [vmem:[#allocation5] sm:$0xff] %vm196_vm2, %v423_v62 }
 0x526   :  { %v517_v63 = vld [vmem:[#allocation5] sm:$0xff] }
 0x527   :  { %519 = vrot.lane.b32.xlu1 %v517_v63, %s2855_s24 }
 0x58f   :  { %v428_v6 = vpop.permute.xlu0 %427 }
 0x590   :  { %430 = vst.msk [vmem:[#allocation4] sm:$0xff] %vm196_vm2, %v428_v6  ;;  %432 = vst.msk [vmem:[#allocation2 + $0x8] sm:$0xff] %vm196_vm2, %v428_v6 }
 0x597   :  { %v435_v7 = vld [vmem:[#allocation4] sm:$0xff] }
 0x598   :  { %2448 = vmatmul.mubr.msk.f32.vlgmr.msra.gmra.mrb[8].mxu0 %vm196_vm2, %v435_v7 }
 0x599   :  { %2639 = vmatpush3.bf16.msra.mxu0 %v2917_v4  ;;  %2469 = vmatprep.mubr.msk.f32.mxu0 %vm2852_vm3, %v2853_v8  ;;  %v520_v24 = vpop.permute.xlu1 %519 }
 0x59a   :  { %2640 = vmatprep.subr.bf16.mxu0 %v2851_v0 }
 0x59d   :  { %2642 = vmatpush3.bf16.msra.mxu0 %v2942_v10 }
 0x59e   :  { %2649 = vmatprep.subr.bf16.mxu0 %v2851_v0 }
 0x66b   :  { %v505_v14 = vpop.f32.mrb[8].mxu0 }
 0x66c   :  { %v509_v15 = vadd.f32 %v505_v14, %v160_v12  ;;  %v2449_v16 = vpop.f32.mrb[9].mxu0 }
 0x66e   :  { %2739 = vtanh.f32 %v509_v15  ;;  %v2264_v18 = vmul.f32 -1.442695, %v509_v15 }
 0x670   :  { %2741 = vpow2.f32 %v2264_v18 }
 0x678   :  { %v2740_v17 = vpop.eup %2739 }
 0x679   :  { %524 = vrot.lane.b32.xlu0 %v2740_v17, %s2854_s23 }
 0x67a   :  { %v2742_v19 = vpop.eup %2741 }
 0x67b   :  { %v513_v20 = vadd.f32 1.0, %v2742_v19 }
 0x67d   :  { %2743 = vrcp.f32 %v513_v20 }
 0x687   :  { %v2744_v21 = vpop.eup %2743 }
 0x688   :  { %v522_v25 = vmul.f32 %v2744_v21, %v520_v24 }
 0x6eb   :  { %v525_v22 = vpop.permute.xlu0 %524 }
 0x6ec   :  { %v527_v23 = vmul.f32 %v2744_v21, %v525_v22 }
 0x6ee   :  { %529 = vrot.lane.b32.xlu0 %v527_v23, %s2855_s24  ;;  %v175_v23 = vadd.f32 %v3016_v3, %v2962_v13 }
 0x760   :  { %v530_v26 = vpop.permute.xlu0 %529 }
 0x761   :  { %v532_v27 = vadd.f32 %v530_v26, %v522_v25 }
 0x763   :  { %2745 = vtanh.f32 %v532_v27 }
 0x76d   :  { %v2746_v28 = vpop.eup %2745 }
 0x76e   :  { %535 = vrot.lane.b32.xlu1 %v2746_v28, %s2854_s23 }
 0x772   :  { %540 = vrot.lane.b32.xlu1 %v532_v27, %s2856_s3 }
 0x7e0   :  { %v536_v29 = vpop.permute.xlu1 %535 }
 0x7e1   :  { %v538_v30 = vmul.f32 %v2744_v21, %v536_v29 }
 0x7e3   :  { %545 = vrot.lane.b32.xlu0 %v538_v30, %s2855_s24 }
 0x7e4   :  { %v541_v31 = vpop.permute.xlu1 %540 }
 0x7e5   :  { %543 = vst.msk [vmem:[#allocation5] sm:$0xff] %vm196_vm2, %v541_v31 }
 0x7ec   :  { %v635_v32 = vld [vmem:[#allocation5] sm:$0xff] }
 0x7ed   :  { %637 = vrot.lane.b32.xlu1 %v635_v32, %s2855_s24 }
 0x855   :  { %v546_v33 = vpop.permute.xlu0 %545 }
 0x856   :  { %548 = vst.msk [vmem:[#allocation4] sm:$0xff] %vm196_vm2, %v546_v33  ;;  %550 = vst.msk [vmem:[#allocation2 + $0x10] sm:$0xff] %vm196_vm2, %v546_v33 }
 0x85d   :  { %v553_v34 = vld [vmem:[#allocation4] sm:$0xff] }
 0x85e   :  { %2459 = vmatmul.mubr.msk.f32.vlgmr.msra.gmra.mrb[4].mxu1 %vm196_vm2, %v553_v34 }
 0x85f   :  { %2645 = vmatpush3.bf16.msra.mxu1 %v2917_v4  ;;  %2480 = vmatprep.mubr.msk.f32.mxu1 %vm2852_vm3, %v2853_v8  ;;  %v638_v46 = vpop.permute.xlu1 %637 }
 0x860   :  { %2646 = vmatprep.subr.bf16.mxu1 %v2851_v0 }
 0x863   :  { %2648 = vmatpush3.bf16.msra.mxu1 %v2942_v10 }
 0x864   :  { %2655 = vmatprep.subr.bf16.mxu1 %v2851_v0 }
 0x931   :  { %v623_v36 = vpop.f32.mrb[4].mxu1 }
 0x932   :  { %v627_v37 = vadd.f32 %v623_v36, %v165_v35  ;;  %v2460_v38 = vpop.f32.mrb[5].mxu1  ;;  %v1141_v36 = vld [vmem:[%s3328_s4] sm:$0xff] }
 0x934   :  { %2747 = vtanh.f32 %v627_v37  ;;  %v2266_v40 = vmul.f32 -1.442695, %v627_v37  ;;  %v1142_v37 = vld [vmem:[%s3328_s4 + $0x8] sm:$0xff] }
 0x935   :  { %v2661_v38 = vpack.c.bf16 %v1142_v37, %v1141_v36  ;;  %v1145_v37 = vld [vmem:[%s3329_s5] sm:$0xff] }
 0x936   :  { %2749 = vpow2.f32 %v2266_v40 }
 0x93e   :  { %v2748_v39 = vpop.eup %2747 }
 0x93f   :  { %642 = vrot.lane.b32.xlu0 %v2748_v39, %s2854_s23 }
 0x940   :  { %v2750_v41 = vpop.eup %2749 }
 0x941   :  { %v631_v42 = vadd.f32 1.0, %v2750_v41 }
 0x943   :  { %2751 = vrcp.f32 %v631_v42 }
 0x94d   :  { %v2752_v43 = vpop.eup %2751 }
 0x94e   :  { %v640_v47 = vmul.f32 %v2752_v43, %v638_v46 }
 0x9b1   :  { %v643_v44 = vpop.permute.xlu0 %642 }
 0x9b2   :  { %v645_v45 = vmul.f32 %v2752_v43, %v643_v44  ;;  %v1143_v44 = vld [vmem:[%s3328_s4 + $0x10] sm:$0xff] }
 0x9b4   :  { %647 = vrot.lane.b32.xlu0 %v645_v45, %s2855_s24  ;;  %v1144_v45 = vld [vmem:[%s3328_s4 + $0x18] sm:$0xff] }
 0x9b5   :  { %v2665_v46 = vpack.c.bf16 %v1144_v45, %v1143_v44 }
 0xa26   :  { %v648_v48 = vpop.permute.xlu0 %647 }
 0xa27   :  { %v650_v49 = vadd.f32 %v648_v48, %v640_v47  ;;  %v1150_v48 = vld [vmem:[#allocation2] sm:$0xff] }
 0xa29   :  { %2753 = vtanh.f32 %v650_v49 }
 0xa33   :  { %v2754_v50 = vpop.eup %2753 }
 0xa34   :  { %653 = vrot.lane.b32.xlu1 %v2754_v50, %s2854_s23  ;;  %v1152_v50 = vld [vmem:[#allocation2 + $0x10] sm:$0xff] }
 0xa38   :  { %658 = vrot.lane.b32.xlu1 %v650_v49, %s2856_s3  ;;  %v1151_v49 = vld [vmem:[#allocation2 + $0x8] sm:$0xff] }
 0xaa6   :  { %v654_v51 = vpop.permute.xlu1 %653 }
 0xaa7   :  { %v656_v52 = vmul.f32 %v2752_v43, %v654_v51 }
 0xaa9   :  { %663 = vrot.lane.b32.xlu0 %v656_v52, %s2855_s24 }
 0xaaa   :  { %v659_v53 = vpop.permute.xlu1 %658 }
 0xaab   :  { %661 = vst.msk [vmem:[#allocation5] sm:$0xff] %vm196_vm2, %v659_v53 }
 0xab2   :  { %v753_v54 = vld [vmem:[#allocation5] sm:$0xff] }
 0xab3   :  { %755 = vrot.lane.b32.xlu1 %v753_v54, %s2855_s24  ;;  %v180_v54 = vadd.f32 %v2962_v13, %v3031_v11 }
 0xb1b   :  { %v664_v55 = vpop.permute.xlu0 %663 }
 0xb1c   :  { %666 = vst.msk [vmem:[#allocation4] sm:$0xff] %vm196_vm2, %v664_v55  ;;  %668 = vst.msk [vmem:[#allocation2 + $0x18] sm:$0xff] %vm196_vm2, %v664_v55 }
 0xb23   :  { %v671_v56 = vld [vmem:[#allocation4] sm:$0xff]  ;;  %v1153_v51 = vld [vmem:[#allocation2 + $0x18] sm:$0xff] }
 0xb24   :  { %2470 = vmatmul.mubr.msk.f32.vlgmr.msra.gmra.mrb[10].mxu0 %vm196_vm2, %v671_v56 }
 0xb25   :  { %2651 = vmatpush3.bf16.msra.mxu0 %v2917_v4  ;;  %2491 = vmatprep.mubr.msk.f32.mxu0 %vm2852_vm3, %v2853_v8  ;;  %v756_v12 = vpop.permute.xlu1 %755 }
 0xb26   :  { %2652 = vmatprep.subr.bf16.mxu0 %v2851_v0 }
 0xb29   :  { %2654 = vmatpush3.bf16.msra.mxu0 %v2942_v10 }
 0xb2a   :  { %2662 = vmatprep.subr.bf16.mxu0 %v2661_v38 }
 0xbf7   :  { %v741_v58 = vpop.f32.mrb[10].mxu0 }
 0xbf8   :  { %v745_v59 = vadd.f32 %v741_v58, %v170_v57  ;;  %v2471_v60 = vpop.f32.mrb[11].mxu0 }
 0xbfa   :  { %2755 = vtanh.f32 %v745_v59  ;;  %v2268_v62 = vmul.f32 -1.442695, %v745_v59 }
 0xbfc   :  { %2757 = vpow2.f32 %v2268_v62 }
 0xc04   :  { %v2756_v61 = vpop.eup %2755 }
 0xc05   :  { %760 = vrot.lane.b32.xlu0 %v2756_v61, %s2854_s23 }
 0xc06   :  { %v2758_v63 = vpop.eup %2757 }
 0xc07   :  { %v749_v1 = vadd.f32 1.0, %v2758_v63 }
 0xc09   :  { %2759 = vrcp.f32 %v749_v1 }
 0xc13   :  { %v2760_v2 = vpop.eup %2759 }
 0xc14   :  { %v758_v14 = vmul.f32 %v2760_v2, %v756_v12 }
 0xc77   :  { %v761_v6 = vpop.permute.xlu0 %760 }
 0xc78   :  { %v763_v7 = vmul.f32 %v2760_v2, %v761_v6 }
 0xc7a   :  { %765 = vrot.lane.b32.xlu0 %v763_v7, %s2855_s24 }
 0xcec   :  { %v766_v5 = vpop.permute.xlu0 %765 }
 0xced   :  { %v768_v15 = vadd.f32 %v766_v5, %v758_v14 }
 0xcef   :  { %2761 = vtanh.f32 %v768_v15 }
 0xcf9   :  { %v2762_v16 = vpop.eup %2761 }
 0xcfa   :  { %771 = vrot.lane.b32.xlu1 %v2762_v16, %s2854_s23 }
 0xcfe   :  { %776 = vrot.lane.b32.xlu1 %v768_v15, %s2856_s3 }
 0xd6c   :  { %v772_v17 = vpop.permute.xlu1 %771 }
 0xd6d   :  { %v774_v18 = vmul.f32 %v2760_v2, %v772_v17 }
 0xd6f   :  { %781 = vrot.lane.b32.xlu0 %v774_v18, %s2855_s24 }
 0xd70   :  { %v777_v19 = vpop.permute.xlu1 %776 }
 0xd71   :  { %779 = vst.msk [vmem:[#allocation5] sm:$0xff] %vm196_vm2, %v777_v19 }
 0xd78   :  { %v871_v20 = vld [vmem:[#allocation5] sm:$0xff] }
 0xd79   :  { %873 = vrot.lane.b32.xlu1 %v871_v20, %s2855_s24 }
 0xde1   :  { %v782_v21 = vpop.permute.xlu0 %781 }
 0xde2   :  { %784 = vst.msk [vmem:[#allocation4] sm:$0xff] %vm196_vm2, %v782_v21  ;;  %786 = vst.msk [vmem:[#allocation2 + $0x20] sm:$0xff] %vm196_vm2, %v782_v21 }
 0xde9   :  { %v789_v22 = vld [vmem:[#allocation4] sm:$0xff] }
 0xdea   :  { %2481 = vmatmul.mubr.msk.f32.vlgmr.msra.gmra.mrb[6].mxu1 %vm196_vm2, %v789_v22  ;;  %v1154_v52 = vld [vmem:[#allocation2 + $0x20] sm:$0xff] }
 0xdeb   :  { %2657 = vmatpush3.bf16.msra.mxu1 %v2917_v4  ;;  %2502 = vmatprep.mubr.msk.f32.mxu1 %vm2852_vm3, %v2853_v8  ;;  %v874_v32 = vpop.permute.xlu1 %873 }
 0xdec   :  { %2658 = vmatprep.subr.bf16.mxu1 %v2851_v0 }
 0xdef   :  { %2660 = vmatpush3.bf16.msra.mxu1 %v2942_v10 }
 0xdf0   :  { %2669 = vmatprep.subr.bf16.mxu1 %v2851_v0 }
 0xebd   :  { %v859_v24 = vpop.f32.mrb[6].mxu1 }
 0xebe   :  { %v863_v25 = vadd.f32 %v859_v24, %v175_v23  ;;  %v2482_v26 = vpop.f32.mrb[7].mxu1 }
 0xebf   :  { %v185_v26 = vadd.f32 %v3029_v9, %v2962_v13 }
 0xec0   :  { %2763 = vtanh.f32 %v863_v25  ;;  %v2270_v4 = vmul.f32 -1.442695, %v863_v25 }
 0xec2   :  { %2765 = vpow2.f32 %v2270_v4 }
 0xeca   :  { %v2764_v27 = vpop.eup %2763 }
 0xecb   :  { %878 = vrot.lane.b32.xlu0 %v2764_v27, %s2854_s23 }
 0xecc   :  { %v2766_v28 = vpop.eup %2765 }
 0xecd   :  { %v867_v29 = vadd.f32 1.0, %v2766_v28 }
 0xecf   :  { %2767 = vrcp.f32 %v867_v29 }
 0xed9   :  { %v2768_v30 = vpop.eup %2767 }
 0xeda   :  { %v876_v33 = vmul.f32 %v2768_v30, %v874_v32 }
 0xf3d   :  { %v879_v31 = vpop.permute.xlu0 %878 }
 0xf3e   :  { %v881_v10 = vmul.f32 %v2768_v30, %v879_v31 }
 0xf40   :  { %883 = vrot.lane.b32.xlu0 %v881_v10, %s2855_s24 }
 0xfb2   :  { %v884_v3 = vpop.permute.xlu0 %883 }
 0xfb3   :  { %v886_v34 = vadd.f32 %v884_v3, %v876_v33 }
 0xfb5   :  { %2769 = vtanh.f32 %v886_v34 }
 0xfbf   :  { %v2770_v35 = vpop.eup %2769 }
 0xfc0   :  { %889 = vrot.lane.b32.xlu1 %v2770_v35, %s2854_s23 }
 0xfc4   :  { %894 = vrot.lane.b32.xlu1 %v886_v34, %s2856_s3 }
0x1032   :  { %v890_v39 = vpop.permute.xlu1 %889 }
0x1033   :  { %v892_v40 = vmul.f32 %v2768_v30, %v890_v39 }
0x1035   :  { %899 = vrot.lane.b32.xlu0 %v892_v40, %s2855_s24  ;;  %v1147_v40 = vld [vmem:[%s3329_s5 + $0x10] sm:$0xff] }
0x1036   :  { %v895_v41 = vpop.permute.xlu1 %894 }
0x1037   :  { %897 = vst.msk [vmem:[#allocation5] sm:$0xff] %vm196_vm2, %v895_v41  ;;  %v1148_v41 = vld [vmem:[%s3329_s5 + $0x18] sm:$0xff] }
0x103e   :  { %v989_v42 = vld [vmem:[#allocation5] sm:$0xff] }
0x103f   :  { %991 = vrot.lane.b32.xlu1 %v989_v42, %s2855_s24  ;;  %v3163_v42 = vpack.c.bf16 %v1148_v41, %v1147_v40 }
0x10a7   :  { %v900_v43 = vpop.permute.xlu0 %899 }
0x10a8   :  { %902 = vst.msk [vmem:[#allocation4] sm:$0xff] %vm196_vm2, %v900_v43  ;;  %904 = vst.msk [vmem:[#allocation2 + $0x28] sm:$0xff] %vm196_vm2, %v900_v43 }
0x10af   :  { %v907_v47 = vld [vmem:[#allocation4] sm:$0xff]  ;;  %v1155_v53 = vld [vmem:[#allocation2 + $0x28] sm:$0xff] }
0x10b0   :  { %2492 = vmatmul.mubr.msk.f32.vlgmr.msra.gmra.mrb[12].mxu0 %vm196_vm2, %v907_v47 }
0x10b1   :  { %2664 = vmatpush3.bf16.msra.mxu0 %v2661_v38  ;;  %2513 = vmatprep.mubr.msk.f32.mxu0 %vm196_vm2, %v1150_v48  ;;  %v992_v5 = vpop.permute.xlu1 %991  ;;  %v1146_v38 = vld [vmem:[%s3329_s5 + $0x8] sm:$0xff] }
0x10b2   :  { %2666 = vmatprep.subr.bf16.mxu0 %v2665_v46  ;;  %v3154_v39 = vpack.c.bf16 %v1146_v38, %v1145_v37 }
0x10b5   :  { %2668 = vmatpush3.bf16.msra.mxu0 %v2665_v46 }
0x10b6   :  { %2681 = vmatprep.subr.bf16.mxu0 %v2851_v0 }
0x10b8   :  { %2514 = vmatmul.mubr.msk.f32.vlgmr.msra.gmra.mrb[14].mxu0 %vm196_vm2, %v1151_v49 }
0x10b9   :  { %2516 = vmatprep.mubr.msk.f32.mxu0 %vm196_vm2, %v1152_v50  ;;  %2683 = vmatpush3.bf16.msra.mxu0 %v3154_v39  ;;  %v3194_v50 = vld [vmem:[%s3330_s6] ss:$0 sm:$0xff] }
0x10ba   :  { %2684 = vmatprep.subr.bf16.mxu0 %v2851_v0 }
0x10bc   :  { %2517 = vmatmul.mubr.msk.f32.gmra.mrb[16].mxu0 %vm196_vm2, %v1153_v51 }
0x10bd   :  { %2519 = vmatprep.mubr.msk.f32.mxu0 %vm196_vm2, %v1154_v52  ;;  %2686 = vmatpush3.bf16.msra.mxu0 %v3163_v42 }
0x10be   :  { %2693 = vmatprep.subr.bf16.mxu0 %v2851_v0 }
0x10c0   :  { %2520 = vmatmul.mubr.msk.f32.gmra.mrb[18].mxu0 %vm196_vm2, %v1155_v53 }
0x1183   :  { %v977_v55 = vpop.f32.mrb[12].mxu0 }
0x1184   :  { %v981_v56 = vadd.f32 %v977_v55, %v180_v54  ;;  %v2493_v57 = vpop.f32.mrb[13].mxu0 }
0x1186   :  { %2771 = vtanh.f32 %v981_v56  ;;  %v2272_v11 = vmul.f32 -1.442695, %v981_v56 }
0x1188   :  { %2773 = vpow2.f32 %v2272_v11 }
0x118b   :  { %v3117_v58 = vpop.f32.mrb[14].mxu0 }
0x118c   :  { %v3119_v59 = vpop.f32.mrb[15].mxu0 }
0x118d   :  { %v1255_v51 = vadd.f32 %v3194_v50, %v3119_v59 }
0x118f   :  { %v3121_v60 = vpop.f32.mrb[16].mxu0 }
0x1190   :  { %v2772_v61 = vpop.eup %2771  ;;  %v3123_v62 = vpop.f32.mrb[17].mxu0 }
0x1191   :  { %996 = vrot.lane.b32.xlu0 %v2772_v61, %s2854_s23  ;;  %v1265_v40 = vadd.f32 %v3194_v50, %v3123_v62 }
0x1192   :  { %v2774_v2 = vpop.eup %2773 }
0x1193   :  { %v3126_v63 = vpop.f32.mrb[18].mxu0  ;;  %v985_v6 = vadd.f32 1.0, %v2774_v2 }
0x1194   :  { %v3128_v1 = vpop.f32.mrb[19].mxu0 }
0x1195   :  { %2775 = vrcp.f32 %v985_v6 }
0x119f   :  { %v2776_v7 = vpop.eup %2775 }
0x11a0   :  { %v994_v15 = vmul.f32 %v2776_v7, %v992_v5 }
0x1203   :  { %v997_v12 = vpop.permute.xlu0 %996 }
0x1204   :  { %v999_v14 = vmul.f32 %v2776_v7, %v997_v12 }
0x1206   :  { %1001 = vrot.lane.b32.xlu0 %v999_v14, %s2855_s24 }
0x1278   :  { %v1002_v16 = vpop.permute.xlu0 %1001 }
0x1279   :  { %v1004_v17 = vadd.f32 %v1002_v16, %v994_v15 }
0x127b   :  { %2777 = vtanh.f32 %v1004_v17 }
0x1285   :  { %v2778_v18 = vpop.eup %2777 }
0x1286   :  { %1007 = vrot.lane.b32.xlu1 %v2778_v18, %s2854_s23 }
0x128a   :  { %1012 = vrot.lane.b32.xlu1 %v1004_v17, %s2856_s3 }
0x12f8   :  { %v1008_v19 = vpop.permute.xlu1 %1007 }
0x12f9   :  { %v1010_v20 = vmul.f32 %v2776_v7, %v1008_v19 }
0x12fb   :  { %1017 = vrot.lane.b32.xlu0 %v1010_v20, %s2855_s24 }
0x12fc   :  { %v1013_v21 = vpop.permute.xlu1 %1012 }
0x12fd   :  { %1015 = vst.msk [vmem:[#allocation5] sm:$0xff] %vm196_vm2, %v1013_v21 }
0x1304   :  { %v1107_v22 = vld [vmem:[#allocation5] sm:$0xff] }
0x1305   :  { %1109 = vrot.lane.b32.xlu1 %v1107_v22, %s2855_s24 }
0x136d   :  { %v1018_v23 = vpop.permute.xlu0 %1017 }
0x136e   :  { %1020 = vst.msk [vmem:[#allocation4] sm:$0xff] %vm196_vm2, %v1018_v23  ;;  %1022 = vst.msk [vmem:[#allocation2 + $0x30] sm:$0xff] %vm196_vm2, %v1018_v23  ;;  %v1260_v23 = vadd.f32 %v3117_v58, %v3194_v50 }
0x1375   :  { %v1025_v24 = vld [vmem:[#allocation4] sm:$0xff]  ;;  %v1156_v25 = vld [vmem:[#allocation2 + $0x30] sm:$0xff] }
0x1376   :  { %2503 = vmatmul.mubr.msk.f32.vlgmr.msra.gmra.mrb[8].mxu1 %vm196_vm2, %v1025_v24  ;;  %2522 = vmatprep.mubr.msk.f32.mxu0 %vm196_vm2, %v1156_v25 }
0x1377   :  { %2533 = vmatprep.mubr.msk.f32.mxu1 %vm2852_vm3, %v2853_v8  ;;  %v1110_v34 = vpop.permute.xlu1 %1109  ;;  %2671 = vmatpush3.bf16.msra.mxu1 %v3154_v39 }
0x1378   :  { %2672 = vmatprep.subr.bf16.mxu1 %v2851_v0 }
0x137b   :  { %2674 = vmatpush3.bf16.msra.mxu1 %v3163_v42 }
0x137c   :  { %2675 = vmatprep.subr.bf16.mxu1 %v2851_v0 }
0x1449   :  { %v1095_v27 = vpop.f32.mrb[8].mxu1 }
0x144a   :  { %v1099_v4 = vadd.f32 %v1095_v27, %v185_v26  ;;  %v2504_v28 = vpop.f32.mrb[9].mxu1 }
0x144c   :  { %2779 = vtanh.f32 %v1099_v4  ;;  %v2274_v30 = vmul.f32 -1.442695, %v1099_v4 }
0x144e   :  { %2781 = vpow2.f32 %v2274_v30 }
0x1456   :  { %v2780_v29 = vpop.eup %2779 }
0x1457   :  { %1114 = vrot.lane.b32.xlu0 %v2780_v29, %s2854_s23 }
0x1458   :  { %v2782_v31 = vpop.eup %2781 }
0x1459   :  { %v1103_v10 = vadd.f32 1.0, %v2782_v31 }
0x145b   :  { %2783 = vrcp.f32 %v1103_v10 }
0x1465   :  { %v2784_v32 = vpop.eup %2783 }
0x1466   :  { %v1112_v35 = vmul.f32 %v2784_v32, %v1110_v34 }
0x14c9   :  { %v1115_v33 = vpop.permute.xlu0 %1114 }
0x14ca   :  { %v1117_v3 = vmul.f32 %v2784_v32, %v1115_v33 }
0x14cc   :  { %1119 = vrot.lane.b32.xlu0 %v1117_v3, %s2855_s24 }
0x153e   :  { %v1120_v13 = vpop.permute.xlu0 %1119 }
0x153f   :  { %v1122_v9 = vadd.f32 %v1120_v13, %v1112_v35 }
0x1541   :  { %2785 = vtanh.f32 %v1122_v9 }
0x154b   :  { %v2786_v36 = vpop.eup %2785 }
0x154c   :  { %1125 = vrot.lane.b32.xlu1 %v2786_v36, %s2854_s23 }
0x1550   :  { %1130 = vrot.lane.b32.xlu1 %v1122_v9, %s2856_s3 }
0x15be   :  { %v1126_v43 = vpop.permute.xlu1 %1125 }
0x15bf   :  { %v1128_v44 = vmul.f32 %v2784_v32, %v1126_v43 }
0x15c1   :  { %1135 = vrot.lane.b32.xlu0 %v1128_v44, %s2855_s24 }
0x15c2   :  { %v1131_v45 = vpop.permute.xlu1 %1130 }
0x15c3   :  { %1133 = vst.msk [vmem:[#allocation5] sm:$0xff] %vm196_vm2, %v1131_v45 }
0x15c4   :  { %1302 = vst.msk [vmem:[#allocation5] sm:$0xff] %vm196_vm2, %v2853_v8 }
0x15cb   :  { %v1386_v46 = vld [vmem:[#allocation5] sm:$0xff] }
0x15cc   :  { %1388 = vrot.lane.b32.xlu1 %v1386_v46, %s2855_s24 }
0x1633   :  { %v1136_v47 = vpop.permute.xlu0 %1135 }
0x1634   :  { %1138 = vst.msk [vmem:[#allocation4] sm:$0xff] %vm196_vm2, %v1136_v47  ;;  %1140 = vst.msk [vmem:[#allocation2 + $0x38] sm:$0xff] %vm196_vm2, %v1136_v47 }
0x1635   :  { %1301 = vst.msk [vmem:[#allocation4] sm:$0xff] %vm196_vm2, %v2853_v8 }
0x163b   :  { %v1157_v48 = vld [vmem:[#allocation2 + $0x38] sm:$0xff] }
0x163c   :  { %2523 = vmatmul.mubr.msk.f32.gmra.mrb[20].mxu0 %vm196_vm2, %v1157_v48  ;;  %v1304_v49 = vld [vmem:[#allocation4] sm:$0xff] }
0x163d   :  { %2534 = vmatmul.mubr.msk.f32.vlgmr.msra.gmra.mrb[10].mxu1 %vm196_vm2, %v1304_v49  ;;  %2555 = vmatprep.mubr.msk.f32.mxu0 %vm2852_vm3, %v2853_v8 }
0x163e   :  { %2677 = vmatpush3.bf16.msra.mxu1 %v3154_v39  ;;  %2544 = vmatprep.mubr.msk.f32.mxu1 %vm2852_vm3, %v2853_v8  ;;  %v1389_v59 = vpop.permute.xlu1 %1388 }
0x163f   :  { %2678 = vmatprep.subr.bf16.mxu1 %v2851_v0 }
0x1642   :  { %2680 = vmatpush3.bf16.msra.mxu1 %v3163_v42 }
0x1643   :  { %2687 = vmatprep.subr.bf16.mxu1 %v2851_v0 }
0x170f   :  { %v3198_v52 = vpop.f32.mrb[20].mxu0 }
0x1710   :  { %v3200_v53 = vpop.f32.mrb[21].mxu0  ;;  %v1374_v54 = vpop.f32.mrb[10].mxu1 }
0x1711   :  { %v1378_v55 = vadd.f32 %v1374_v54, %v1255_v51  ;;  %v2535_v56 = vpop.f32.mrb[11].mxu1 }
0x1713   :  { %2787 = vtanh.f32 %v1378_v55  ;;  %v2285_v61 = vmul.f32 -1.442695, %v1378_v55 }
0x1715   :  { %2789 = vpow2.f32 %v2285_v61 }
0x171d   :  { %v2788_v57 = vpop.eup %2787 }
0x171e   :  { %1393 = vrot.lane.b32.xlu0 %v2788_v57, %s2854_s23 }
0x171f   :  { %v2790_v11 = vpop.eup %2789 }
0x1720   :  { %v1382_v2 = vadd.f32 1.0, %v2790_v11 }
0x1722   :  { %2791 = vrcp.f32 %v1382_v2 }
0x172c   :  { %v2792_v6 = vpop.eup %2791 }
0x172d   :  { %v1391_v14 = vmul.f32 %v2792_v6, %v1389_v59 }
0x1790   :  { %v1394_v7 = vpop.permute.xlu0 %1393 }
0x1791   :  { %v1396_v12 = vmul.f32 %v2792_v6, %v1394_v7 }
0x1793   :  { %1398 = vrot.lane.b32.xlu0 %v1396_v12, %s2855_s24 }
0x1805   :  { %v1399_v5 = vpop.permute.xlu0 %1398 }
0x1806   :  { %v1401_v15 = vadd.f32 %v1399_v5, %v1391_v14  ;;  %v1270_v14 = vadd.f32 %v3121_v60, %v3194_v50 }
0x1808   :  { %2793 = vtanh.f32 %v1401_v15 }
0x1812   :  { %v2794_v16 = vpop.eup %2793 }
0x1813   :  { %1404 = vrot.lane.b32.xlu1 %v2794_v16, %s2854_s23 }
0x1817   :  { %1409 = vrot.lane.b32.xlu1 %v1401_v15, %s2856_s3 }
0x1885   :  { %v1405_v17 = vpop.permute.xlu1 %1404 }
0x1886   :  { %v1407_v18 = vmul.f32 %v2792_v6, %v1405_v17 }
0x1888   :  { %1414 = vrot.lane.b32.xlu0 %v1407_v18, %s2855_s24 }
0x1889   :  { %v1410_v19 = vpop.permute.xlu1 %1409 }
0x188a   :  { %1412 = vst.msk [vmem:[#allocation5] sm:$0xff] %vm196_vm2, %v1410_v19 }
0x1891   :  { %v1501_v20 = vld [vmem:[#allocation5] sm:$0xff] }
0x1892   :  { %1503 = vrot.lane.b32.xlu1 %v1501_v20, %s2855_s24 }
0x18fa   :  { %v1415_v21 = vpop.permute.xlu0 %1414 }
0x18fb   :  { %1417 = vst.msk [vmem:[#allocation4] sm:$0xff] %vm196_vm2, %v1415_v21 }
0x1902   :  { %v1419_v22 = vld [vmem:[#allocation4] sm:$0xff] }
0x1903   :  { %2545 = vmatmul.mubr.msk.f32.vlgmr.msra.gmra.mrb[12].mxu1 %vm196_vm2, %v1419_v22 }
0x1904   :  { %2689 = vmatpush3.bf16.msra.mxu1 %v3154_v39  ;;  %2566 = vmatprep.mubr.msk.f32.mxu1 %vm2852_vm3, %v2853_v8  ;;  %v1504_v32 = vpop.permute.xlu1 %1503 }
0x1905   :  { %2690 = vmatprep.subr.bf16.mxu1 %v2851_v0 }
0x1908   :  { %2692 = vmatpush3.bf16.msra.mxu1 %v3163_v42 }
0x1909   :  { %2699 = vmatprep.subr.bf16.mxu1 %v2851_v0 }
0x19d6   :  { %v1489_v24 = vpop.f32.mrb[12].mxu1 }
0x19d7   :  { %v1493_v25 = vadd.f32 %v1489_v24, %v1260_v23  ;;  %v2546_v26 = vpop.f32.mrb[13].mxu1 }
0x19d9   :  { %2795 = vtanh.f32 %v1493_v25  ;;  %v2287_v4 = vmul.f32 -1.442695, %v1493_v25 }
0x19db   :  { %2797 = vpow2.f32 %v2287_v4 }
0x19e3   :  { %v2796_v27 = vpop.eup %2795 }
0x19e4   :  { %1508 = vrot.lane.b32.xlu0 %v2796_v27, %s2854_s23 }
0x19e5   :  { %v2798_v28 = vpop.eup %2797 }
0x19e6   :  { %v1497_v29 = vadd.f32 1.0, %v2798_v28 }
0x19e8   :  { %2799 = vrcp.f32 %v1497_v29 }
0x19f2   :  { %v2800_v30 = vpop.eup %2799 }
0x19f3   :  { %v1506_v33 = vmul.f32 %v2800_v30, %v1504_v32  ;;  %v1275_v32 = vadd.f32 %v3194_v50, %v3128_v1 }
0x1a56   :  { %v1509_v31 = vpop.permute.xlu0 %1508 }
0x1a57   :  { %v1511_v10 = vmul.f32 %v2800_v30, %v1509_v31 }
0x1a59   :  { %1513 = vrot.lane.b32.xlu0 %v1511_v10, %s2855_s24 }
0x1acb   :  { %v1514_v58 = vpop.permute.xlu0 %1513 }
0x1acc   :  { %v1516_v3 = vadd.f32 %v1514_v58, %v1506_v33 }
0x1ace   :  { %2801 = vtanh.f32 %v1516_v3 }
0x1ad8   :  { %v2802_v34 = vpop.eup %2801 }
0x1ad9   :  { %1519 = vrot.lane.b32.xlu1 %v2802_v34, %s2854_s23 }
0x1add   :  { %1524 = vrot.lane.b32.xlu1 %v1516_v3, %s2856_s3 }
0x1b4b   :  { %v1520_v35 = vpop.permute.xlu1 %1519 }
0x1b4c   :  { %v1522_v13 = vmul.f32 %v2800_v30, %v1520_v35 }
0x1b4e   :  { %1529 = vrot.lane.b32.xlu0 %v1522_v13, %s2855_s24 }
0x1b4f   :  { %v1525_v9 = vpop.permute.xlu1 %1524 }
0x1b50   :  { %1527 = vst.msk [vmem:[#allocation5] sm:$0xff] %vm196_vm2, %v1525_v9 }
0x1b57   :  { %v1616_v36 = vld [vmem:[#allocation5] sm:$0xff] }
0x1b58   :  { %1618 = vrot.lane.b32.xlu1 %v1616_v36, %s2855_s24 }
0x1bc0   :  { %v1530_v37 = vpop.permute.xlu0 %1529 }
0x1bc1   :  { %1532 = vst.msk [vmem:[#allocation4] sm:$0xff] %vm196_vm2, %v1530_v37 }
0x1bc8   :  { %v1534_v38 = vld [vmem:[#allocation4] sm:$0xff] }
0x1bc9   :  { %2556 = vmatmul.mubr.msk.f32.vlgmr.msra.gmra.mrb[22].mxu0 %vm196_vm2, %v1534_v38 }
0x1bca   :  { %2695 = vmatpush3.bf16.msra.mxu0 %v3154_v39  ;;  %2577 = vmatprep.mubr.msk.f32.mxu0 %vm2852_vm3, %v2853_v8  ;;  %v1619_v55 = vpop.permute.xlu1 %1618 }
0x1bcb   :  { %2696 = vmatprep.subr.bf16.mxu0 %v2851_v0 }
0x1bce   :  { %2698 = vmatpush3.bf16.msra.mxu0 %v3163_v42 }
0x1bcf   :  { %2705 = vmatprep.subr.bf16.mxu0 %v2851_v0 }
0x1c9c   :  { %v1604_v41 = vpop.f32.mrb[22].mxu0 }
0x1c9d   :  { %v1608_v43 = vadd.f32 %v1604_v41, %v1265_v40  ;;  %v2557_v44 = vpop.f32.mrb[23].mxu0 }
0x1c9f   :  { %2803 = vtanh.f32 %v1608_v43  ;;  %v2289_v46 = vmul.f32 -1.442695, %v1608_v43 }
0x1ca1   :  { %2805 = vpow2.f32 %v2289_v46 }
0x1ca9   :  { %v2804_v45 = vpop.eup %2803 }
0x1caa   :  { %1623 = vrot.lane.b32.xlu0 %v2804_v45, %s2854_s23 }
0x1cab   :  { %v2806_v47 = vpop.eup %2805 }
0x1cac   :  { %v1612_v48 = vadd.f32 1.0, %v2806_v47 }
0x1cae   :  { %2807 = vrcp.f32 %v1612_v48 }
0x1cb8   :  { %v2808_v49 = vpop.eup %2807 }
0x1cb9   :  { %v1621_v56 = vmul.f32 %v2808_v49, %v1619_v55 }
0x1d1c   :  { %v1624_v51 = vpop.permute.xlu0 %1623 }
0x1d1d   :  { %v1626_v54 = vmul.f32 %v2808_v49, %v1624_v51 }
0x1d1f   :  { %1628 = vrot.lane.b32.xlu0 %v1626_v54, %s2855_s24  ;;  %v1280_v54 = vadd.f32 %v3126_v63, %v3194_v50 }
0x1d91   :  { %v1629_v62 = vpop.permute.xlu0 %1628 }
0x1d92   :  { %v1631_v57 = vadd.f32 %v1629_v62, %v1621_v56 }
0x1d94   :  { %2809 = vtanh.f32 %v1631_v57 }
0x1d9e   :  { %v2810_v61 = vpop.eup %2809 }
0x1d9f   :  { %1634 = vrot.lane.b32.xlu1 %v2810_v61, %s2854_s23 }
0x1da3   :  { %1639 = vrot.lane.b32.xlu1 %v1631_v57, %s2856_s3 }
0x1e11   :  { %v1635_v11 = vpop.permute.xlu1 %1634 }
0x1e12   :  { %v1637_v2 = vmul.f32 %v2808_v49, %v1635_v11 }
0x1e14   :  { %1644 = vrot.lane.b32.xlu0 %v1637_v2, %s2855_s24 }
0x1e15   :  { %v1640_v6 = vpop.permute.xlu1 %1639 }
0x1e16   :  { %1642 = vst.msk [vmem:[#allocation5] sm:$0xff] %vm196_vm2, %v1640_v6 }
0x1e1d   :  { %v1731_v7 = vld [vmem:[#allocation5] sm:$0xff] }
0x1e1e   :  { %1733 = vrot.lane.b32.xlu1 %v1731_v7, %s2855_s24 }
0x1e86   :  { %v1645_v12 = vpop.permute.xlu0 %1644 }
0x1e87   :  { %1647 = vst.msk [vmem:[#allocation4] sm:$0xff] %vm196_vm2, %v1645_v12 }
0x1e8e   :  { %v1649_v59 = vld [vmem:[#allocation4] sm:$0xff] }
0x1e8f   :  { %2567 = vmatmul.mubr.msk.f32.vlgmr.msra.gmra.mrb[14].mxu1 %vm196_vm2, %v1649_v59 }
0x1e90   :  { %2701 = vmatpush3.bf16.msra.mxu1 %v3154_v39  ;;  %2588 = vmatprep.mubr.msk.f32.mxu1 %vm2852_vm3, %v2853_v8  ;;  %v1734_v24 = vpop.permute.xlu1 %1733 }
0x1e91   :  { %2702 = vmatprep.subr.bf16.mxu1 %v2851_v0 }
0x1e94   :  { %2704 = vmatpush3.bf16.msra.mxu1 %v3163_v42 }
0x1e95   :  { %2711 = vmatprep.subr.bf16.mxu1 %v2851_v0 }
0x1f62   :  { %v1719_v5 = vpop.f32.mrb[14].mxu1 }
0x1f63   :  { %v1723_v15 = vadd.f32 %v1719_v5, %v1270_v14  ;;  %v2568_v16 = vpop.f32.mrb[15].mxu1 }
0x1f65   :  { %2811 = vtanh.f32 %v1723_v15  ;;  %v2291_v18 = vmul.f32 -1.442695, %v1723_v15 }
0x1f67   :  { %2813 = vpow2.f32 %v2291_v18  ;;  %v1285_v18 = vadd.f32 %v3194_v50, %v3200_v53 }
0x1f6f   :  { %v2812_v17 = vpop.eup %2811 }
0x1f70   :  { %1738 = vrot.lane.b32.xlu0 %v2812_v17, %s2854_s23 }
0x1f71   :  { %v2814_v19 = vpop.eup %2813 }
0x1f72   :  { %v1727_v20 = vadd.f32 1.0, %v2814_v19 }
0x1f74   :  { %2815 = vrcp.f32 %v1727_v20 }
0x1f7e   :  { %v2816_v21 = vpop.eup %2815 }
0x1f7f   :  { %v1736_v25 = vmul.f32 %v2816_v21, %v1734_v24 }
0x1fe2   :  { %v1739_v22 = vpop.permute.xlu0 %1738 }
0x1fe3   :  { %v1741_v23 = vmul.f32 %v2816_v21, %v1739_v22 }
0x1fe5   :  { %1743 = vrot.lane.b32.xlu0 %v1741_v23, %s2855_s24 }
0x2057   :  { %v1744_v60 = vpop.permute.xlu0 %1743 }
0x2058   :  { %v1746_v26 = vadd.f32 %v1744_v60, %v1736_v25 }
0x205a   :  { %2817 = vtanh.f32 %v1746_v26 }
0x2064   :  { %v2818_v27 = vpop.eup %2817 }
0x2065   :  { %1749 = vrot.lane.b32.xlu1 %v2818_v27, %s2854_s23 }
0x2069   :  { %1754 = vrot.lane.b32.xlu1 %v1746_v26, %s2856_s3 }
0x20d7   :  { %v1750_v4 = vpop.permute.xlu1 %1749 }
0x20d8   :  { %v1752_v28 = vmul.f32 %v2816_v21, %v1750_v4 }
0x20da   :  { %1759 = vrot.lane.b32.xlu0 %v1752_v28, %s2855_s24 }
0x20db   :  { %v1755_v29 = vpop.permute.xlu1 %1754 }
0x20dc   :  { %1757 = vst.msk [vmem:[#allocation5] sm:$0xff] %vm196_vm2, %v1755_v29 }
0x20e3   :  { %v1846_v30 = vld [vmem:[#allocation5] sm:$0xff] }
0x20e4   :  { %1848 = vrot.lane.b32.xlu1 %v1846_v30, %s2855_s24 }
0x214c   :  { %v1760_v31 = vpop.permute.xlu0 %1759 }
0x214d   :  { %1762 = vst.msk [vmem:[#allocation4] sm:$0xff] %vm196_vm2, %v1760_v31 }
0x2154   :  { %v1764_v10 = vld [vmem:[#allocation4] sm:$0xff] }
0x2155   :  { %2578 = vmatmul.mubr.msk.f32.vlgmr.msra.gmra.mrb[24].mxu0 %vm196_vm2, %v1764_v10 }
0x2156   :  { %2707 = vmatpush3.bf16.msra.mxu0 %v3154_v39  ;;  %2599 = vmatprep.mubr.msk.f32.mxu0 %vm2852_vm3, %v2853_v8  ;;  %v1849_v40 = vpop.permute.xlu1 %1848 }
0x2157   :  { %2708 = vmatprep.subr.bf16.mxu0 %v2851_v0 }
0x215a   :  { %2710 = vmatpush3.bf16.msra.mxu0 %v3163_v42 }
0x2228   :  { %v1834_v33 = vpop.f32.mrb[24].mxu0 }
0x2229   :  { %v1838_v58 = vadd.f32 %v1834_v33, %v1275_v32  ;;  %v2579_v3 = vpop.f32.mrb[25].mxu0 }
0x222b   :  { %2819 = vtanh.f32 %v1838_v58  ;;  %v2293_v35 = vmul.f32 -1.442695, %v1838_v58 }
0x222d   :  { %2821 = vpow2.f32 %v2293_v35 }
0x2235   :  { %v2820_v34 = vpop.eup %2819 }
0x2236   :  { %1853 = vrot.lane.b32.xlu0 %v2820_v34, %s2854_s23  ;;  %v1290_v34 = vadd.f32 %v3198_v52, %v3194_v50 }
0x2237   :  { %v2822_v13 = vpop.eup %2821 }
0x2238   :  { %v1842_v9 = vadd.f32 1.0, %v2822_v13 }
0x223a   :  { %2823 = vrcp.f32 %v1842_v9 }
0x2244   :  { %v2824_v36 = vpop.eup %2823 }
0x2245   :  { %v1851_v41 = vmul.f32 %v2824_v36, %v1849_v40 }
0x22a8   :  { %v1854_v37 = vpop.permute.xlu0 %1853 }
0x22a9   :  { %v1856_v38 = vmul.f32 %v2824_v36, %v1854_v37 }
0x22ab   :  { %1858 = vrot.lane.b32.xlu0 %v1856_v38, %s2855_s24 }
0x231d   :  { %v1859_v1 = vpop.permute.xlu0 %1858 }
0x231e   :  { %v1861_v43 = vadd.f32 %v1859_v1, %v1851_v41 }
0x2320   :  { %2825 = vtanh.f32 %v1861_v43 }
0x232a   :  { %v2826_v44 = vpop.eup %2825 }
0x232b   :  { %1864 = vrot.lane.b32.xlu1 %v2826_v44, %s2854_s23 }
0x232f   :  { %1869 = vrot.lane.b32.xlu1 %v1861_v43, %s2856_s3 }
0x239d   :  { %v1865_v45 = vpop.permute.xlu1 %1864 }
0x239e   :  { %v1867_v46 = vmul.f32 %v2824_v36, %v1865_v45 }
0x23a0   :  { %1874 = vrot.lane.b32.xlu0 %v1867_v46, %s2855_s24 }
0x23a1   :  { %v1870_v47 = vpop.permute.xlu1 %1869 }
0x23a2   :  { %1872 = vst.msk [vmem:[#allocation5] sm:$0xff] %vm196_vm2, %v1870_v47 }
0x23a9   :  { %v1961_v48 = vld [vmem:[#allocation5] sm:$0xff] }
0x23aa   :  { %1963 = vrot.lane.b32.xlu1 %v1961_v48, %s2855_s24 }
0x2412   :  { %v1875_v49 = vpop.permute.xlu0 %1874 }
0x2413   :  { %1877 = vst.msk [vmem:[#allocation4] sm:$0xff] %vm196_vm2, %v1875_v49  ;;  %v14_v49 = vstv %s3331_s8 }
0x2414   :  { %15 = vst [vmem:[#allocation6] sm:$0x1] %v14_v49 }
0x241a   :  { %v1879_v51 = vld [vmem:[#allocation4] sm:$0xff] }
0x241b   :  { %2589 = vmatmul.mubr.msk.f32.vlgmr.msra.gmra.mrb[16].mxu1 %vm196_vm2, %v1879_v51 }
0x241c   :  { %2713 = vmatpush3.bf16.msra.mxu1 %v3154_v39  ;;  %2610 = vmatprep.mubr.msk.f32.mxu1 %vm2852_vm3, %v2853_v8 }
0x241d   :  { %2714 = vmatprep.subr.bf16.mxu1 %v2851_v0 }
0x2420   :  { %2716 = vmatpush3.bf16.msra.mxu1 %v3163_v42  ;;  %v1964_v42 = vpop.permute.xlu1 %1963 }
0x24ee   :  { %v1949_v55 = vpop.f32.mrb[16].mxu1 }
0x24ef   :  { %v1953_v56 = vadd.f32 %v1949_v55, %v1280_v54  ;;  %v2590_v62 = vpop.f32.mrb[17].mxu1  ;;  %v2300_v55 = vld [vmem:[%s3332_s7] ss:$0 sm:$0xff] }
0x24f1   :  { %2827 = vtanh.f32 %v1953_v56  ;;  %v2295_v61 = vmul.f32 -1.442695, %v1953_v56 }
0x24f3   :  { %2829 = vpow2.f32 %v2295_v61  ;;  %v2301_v61 = vld [vmem:[#allocation6] ss:$0 sm:$0xff] }
0x24fb   :  { %v2828_v57 = vpop.eup %2827 }
0x24fc   :  { %1968 = vrot.lane.b32.xlu0 %v2828_v57, %s2854_s23 }
0x24fd   :  { %v2830_v39 = vpop.eup %2829 }
0x24fe   :  { %v1957_v11 = vadd.f32 1.0, %v2830_v39 }
0x2500   :  { %2831 = vrcp.f32 %v1957_v11 }
0x250a   :  { %v2832_v8 = vpop.eup %2831 }
0x250b   :  { %v1966_v6 = vmul.f32 %v2832_v8, %v1964_v42 }
0x256e   :  { %v1969_v2 = vpop.permute.xlu0 %1968 }
0x256f   :  { %v1971_v0 = vmul.f32 %v2832_v8, %v1969_v2 }
0x2571   :  { %1973 = vrot.lane.b32.xlu0 %v1971_v0, %s2855_s24 }
0x25e3   :  { %v1974_v63 = vpop.permute.xlu0 %1973 }
0x25e4   :  { %v1976_v7 = vadd.f32 %v1974_v63, %v1966_v6 }
0x25e6   :  { %2833 = vtanh.f32 %v1976_v7 }
0x25f0   :  { %v2834_v12 = vpop.eup %2833 }
0x25f1   :  { %1979 = vrot.lane.b32.xlu1 %v2834_v12, %s2854_s23 }
0x25f5   :  { %1984 = vrot.lane.b32.xlu1 %v1976_v7, %s2856_s3 }
0x2663   :  { %v1980_v59 = vpop.permute.xlu1 %1979 }
0x2664   :  { %v1982_v14 = vmul.f32 %v2832_v8, %v1980_v59 }
0x2666   :  { %1989 = vrot.lane.b32.xlu0 %v1982_v14, %s2855_s24 }
0x2667   :  { %v1985_v5 = vpop.permute.xlu1 %1984 }
0x2668   :  { %1987 = vst.msk [vmem:[#allocation5] sm:$0xff] %vm196_vm2, %v1985_v5 }
0x266f   :  { %v2076_v15 = vld [vmem:[#allocation5] sm:$0xff] }
0x2670   :  { %2078 = vrot.lane.b32.xlu1 %v2076_v15, %s2855_s24 }
0x26d8   :  { %v1990_v16 = vpop.permute.xlu0 %1989 }
0x26d9   :  { %1992 = vst.msk [vmem:[#allocation4] sm:$0xff] %vm196_vm2, %v1990_v16 }
0x26e0   :  { %v1994_v17 = vld [vmem:[#allocation4] sm:$0xff] }
0x26e1   :  { %2600 = vmatmul.mubr.msk.f32.vlgmr.msra.gmra.mrb[26].mxu0 %vm196_vm2, %v1994_v17 }
0x26e2   :  { %v2079_v4 = vpop.permute.xlu1 %2078 }
0x27b4   :  { %v2064_v19 = vpop.f32.mrb[26].mxu0 }
0x27b5   :  { %v2068_v20 = vadd.f32 %v2064_v19, %v1285_v18  ;;  %v2601_v21 = vpop.f32.mrb[27].mxu0 }
0x27b7   :  { %2835 = vtanh.f32 %v2068_v20  ;;  %v2297_v23 = vmul.f32 -1.442695, %v2068_v20 }
0x27b9   :  { %2837 = vpow2.f32 %v2297_v23 }
0x27c1   :  { %v2836_v22 = vpop.eup %2835 }
0x27c2   :  { %2083 = vrot.lane.b32.xlu0 %v2836_v22, %s2854_s23 }
0x27c3   :  { %v2838_v24 = vpop.eup %2837 }
0x27c4   :  { %v2072_v25 = vadd.f32 1.0, %v2838_v24 }
0x27c6   :  { %2839 = vrcp.f32 %v2072_v25 }
0x27d0   :  { %v2840_v60 = vpop.eup %2839 }
0x27d1   :  { %v2081_v28 = vmul.f32 %v2840_v60, %v2079_v4 }
0x2834   :  { %v2084_v26 = vpop.permute.xlu0 %2083 }
0x2835   :  { %v2086_v27 = vmul.f32 %v2840_v60, %v2084_v26 }
0x2837   :  { %2088 = vrot.lane.b32.xlu0 %v2086_v27, %s2855_s24 }
0x28a9   :  { %v2089_v53 = vpop.permute.xlu0 %2088 }
0x28aa   :  { %v2091_v29 = vadd.f32 %v2089_v53, %v2081_v28 }
0x28ac   :  { %2841 = vtanh.f32 %v2091_v29 }
0x28b6   :  { %v2842_v30 = vpop.eup %2841 }
0x28b7   :  { %2094 = vrot.lane.b32.xlu1 %v2842_v30, %s2854_s23 }
0x28bb   :  { %2099 = vrot.lane.b32.xlu1 %v2091_v29, %s2856_s3 }
0x2929   :  { %v2095_v31 = vpop.permute.xlu1 %2094 }
0x292a   :  { %v2097_v10 = vmul.f32 %v2840_v60, %v2095_v31 }
0x292c   :  { %2104 = vrot.lane.b32.xlu0 %v2097_v10, %s2855_s24 }
0x292d   :  { %v2100_v32 = vpop.permute.xlu1 %2099 }
0x292e   :  { %2102 = vst.msk [vmem:[#allocation5] sm:$0xff] %vm196_vm2, %v2100_v32 }
0x2935   :  { %v2191_v33 = vld [vmem:[#allocation5] sm:$0xff] }
0x2936   :  { %2193 = vrot.lane.b32.xlu1 %v2191_v33, %s2855_s24 }
0x299e   :  { %v2105_v58 = vpop.permute.xlu0 %2104 }
0x299f   :  { %2107 = vst.msk [vmem:[#allocation4] sm:$0xff] %vm196_vm2, %v2105_v58 }
0x29a6   :  { %v2109_v3 = vld [vmem:[#allocation4] sm:$0xff] }
0x29a7   :  { %2611 = vmatmul.mubr.msk.f32.vlgmr.msra.gmra.mrb[18].mxu1 %vm196_vm2, %v2109_v3 }
0x29a8   :  { %v2194_v44 = vpop.permute.xlu1 %2193 }
0x2a7a   :  { %v2179_v35 = vpop.f32.mrb[18].mxu1 }
0x2a7b   :  { %v2183_v13 = vadd.f32 %v2179_v35, %v1290_v34  ;;  %v2612_v9 = vpop.f32.mrb[19].mxu1 }
0x2a7d   :  { %2843 = vtanh.f32 %v2183_v13  ;;  %v2299_v37 = vmul.f32 -1.442695, %v2183_v13 }
0x2a7f   :  { %2845 = vpow2.f32 %v2299_v37 }
0x2a87   :  { %v2844_v36 = vpop.eup %2843 }
0x2a88   :  { %2198 = vrot.lane.b32.xlu0 %v2844_v36, %s2854_s23 }
0x2a89   :  { %v2846_v38 = vpop.eup %2845 }
0x2a8a   :  { %v2187_v40 = vadd.f32 1.0, %v2846_v38 }
0x2a8c   :  { %2847 = vrcp.f32 %v2187_v40 }
0x2a96   :  { %v2848_v41 = vpop.eup %2847 }
0x2a97   :  { %v2196_v45 = vmul.f32 %v2848_v41, %v2194_v44 }
0x2afa   :  { %v2199_v1 = vpop.permute.xlu0 %2198 }
0x2afb   :  { %v2201_v43 = vmul.f32 %v2848_v41, %v2199_v1 }
0x2afd   :  { %2203 = vrot.lane.b32.xlu0 %v2201_v43, %s2855_s24 }
0x2b6f   :  { %v2204_v50 = vpop.permute.xlu0 %2203 }
0x2b70   :  { %v2206_v52 = vadd.f32 %v2204_v50, %v2196_v45 }
0x2b72   :  { %2849 = vtanh.f32 %v2206_v52 }
0x2b7c   :  { %v2850_v46 = vpop.eup %2849 }
0x2b7d   :  { %2209 = vrot.lane.b32.xlu1 %v2850_v46, %s2854_s23 }
0x2bef   :  { %v2210_v47 = vpop.permute.xlu1 %2209 }
0x2bf0   :  { %v2212_v48 = vmul.f32 %v2848_v41, %v2210_v47 }
0x2bf2   :  { %2219 = vrot.lane.b32.xlu0 %v2212_v48, %s2855_s24 }
0x2bf6   :  { %2214 = vrot.lane.b32.xlu0 %v2206_v52, %s2856_s3 }
0x2c64   :  { %v2220_v51 = vpop.permute.xlu0 %2219 }
0x2c65   :  { %2222 = vst.msk [vmem:[#allocation4] sm:$0xff] %vm196_vm2, %v2220_v51 }
0x2c68   :  { %v2215_v54 = vpop.permute.xlu0 %2214 }
0x2c69   :  { %2217 = vst.msk [vmem:[#allocation5] sm:$0xff] %vm196_vm2, %v2215_v54 }
0x2c6c   :  { %v2223_v56 = vld [vmem:[#allocation4] sm:$0xff] }
0x2c6d   :  { %v2231_v62 = vmul.f32 %v2300_v55, %v2223_v56 }
0x2c6f   :  { %v2232_v57 = vsel %vm196_vm2, %v2231_v62, 0.0 }
0x2c70   :  { %2233 = vadd.xlane.f32.xlu1 %v2232_v57 }
0x2cfd   :  { %v2234_v39 = vpop.xlane.xlu1 %2233 }
0x2cfe   :  { %v2242_v11 = vadd.f32 %v2301_v61, %v2234_v39 }
0x2d00   :  { %2244 = vst.msk [vmem:[%s3333_s9] sm:$0xff] %vm2243_vm4, %v2242_v11 }

</bundles_post_ra>
